<compile_context>
chip_gen: v5e
topology: v5e:2x2
jax: 0.10.0
libtpu: 0.0.40
codegen_flags: <defaults>
</compile_context>

<pallas_src>
import functools

import jax
import jax.numpy as jnp
import numpy as np
from jax import lax
from jax.experimental import pallas as pl
from jax.experimental.pallas import tpu as pltpu

_BIG = 1e18  # sentinel "squared distance" for non-boundary pixels / empty sets


# ----------------------------- kernel helpers ------------------------------ #
def _min_unrolled(term_fn, n, n_chains=4):
    """min_{i in [0, n)} term_fn(i) with `n_chains` independent accumulator
    chains (ILP for the VALU) combined by a small tree at the end."""
    k = min(n_chains, n)
    accs = [term_fn(i) for i in range(k)]
    for i in range(k, n):
        accs[i % k] = jnp.minimum(accs[i % k], term_fn(i))
    while len(accs) > 1:
        nxt = [jnp.minimum(accs[j], accs[j + 1])
               for j in range(0, len(accs) - 1, 2)]
        if len(accs) % 2:
            nxt.append(accs[-1])
        accs = nxt
    return accs[0]


def _boundary_mask(img, not_left_edge, not_right_edge):
    """Pixels with at least one in-image 4-neighbour holding a different label.

    `img` is a lane-packed (H, L) strip of independent W-wide images; the
    left/right comparisons are masked at the packing seams so neighbours are
    never taken from an adjacent image (reproduces per-image replicate-edge
    behaviour of the reference extract_boundaries).
    """
    up = jnp.concatenate([img[:1, :], img[:-1, :]], axis=0)
    down = jnp.concatenate([img[1:, :], img[-1:, :]], axis=0)
    left = jnp.concatenate([img[:, :1], img[:, :-1]], axis=1)
    right = jnp.concatenate([img[:, 1:], img[:, -1:]], axis=1)
    return ((img != up) | (img != down)
            | ((img != left) & not_left_edge)
            | ((img != right) & not_right_edge))


# --------------------------------- kernel ---------------------------------- #
def _hausdorff_kernel(logits_ref, target_ref, out_ref, *, G, W):
    # logits_ref: (1, C, H, G*W)   target_ref: (1, H, G*W)   out_ref: (1, 1, G)
    _, C, H, GW = logits_ref.shape
    L = 2 * GW   # [ pred strip | target strip ], lane-packed

    # ---- per-pixel argmax over channels (first max wins, like np.argmax) ----
    best = logits_ref[0, 0]
    pred = jnp.zeros((H, GW), dtype=jnp.int32)
    for c in range(1, C):
        x = logits_ref[0, c]
        take = x > best
        pred = jnp.where(take, jnp.int32(c), pred)
        best = jnp.where(take, x, best)

    # ---- lane-pack pred & target into ONE label field ----
    lbl = jnp.concatenate([pred, target_ref[0]], axis=1)        # (H, 2*G*W)

    # ---- hoisted seam masks (built once per grid step) ----
    colidx = lax.broadcasted_iota(jnp.int32, (H, L), 1)
    is_left = colidx == 0
    is_right = colidx == (W - 1)
    for g in range(1, 2 * G):
        is_left = is_left | (colidx == g * W)
        is_right = is_right | (colidx == g * W + W - 1)
    not_left = jnp.logical_not(is_left)
    not_right = jnp.logical_not(is_right)

    # ---- label boundaries and penalty field (single pass, packed) ----
    b = _boundary_mask(lbl, not_left, not_right)
    pen = jnp.where(b, 0.0, _BIG).astype(jnp.float32)

    # ---- stage 1: t[a, j] = min_c ((a - c)^2 + pen[c, j])  (lane-packed) ----
    rcol = lax.broadcasted_iota(jnp.int32, (H, 1), 0).astype(jnp.float32)
    t = _min_unrolled(lambda c: (rcol - float(c)) ** 2 + pen[c:c + 1, :], H)

    # Single transpose so stage-2 uses sublane slices (no per-column lane
    # extraction).  t == 0 exactly at boundary pixels, so the transposed
    # boundary masks come for free from tT.
    tT = jnp.transpose(t)   # (2*G*W, H): rows [0,GW) = pred, [GW,2GW) = target

    # ---- stage 2 (per image): out[b, a] = min_d ((b - d)^2 + tT[base+d, a]) ----
    wcol = lax.broadcasted_iota(jnp.int32, (W, 1), 0).astype(jnp.float32)

    def col_stage(base):
        return _min_unrolled(
            lambda d: (wcol - float(d)) ** 2 + tT[base + d:base + d + 1, :], W)

    lane = lax.broadcasted_iota(jnp.int32, (1, G), 1)
    res = jnp.zeros((1, G), dtype=jnp.float32)
    for g in range(G):
        pbase = g * W            # pred block of image g (transposed)
        tbase = GW + g * W       # target block of image g (transposed)
        mask1 = tT[pbase:pbase + W, :] < 0.5   # pred boundary (transposed)
        mask2 = tT[tbase:tbase + W, :] < 0.5   # target boundary (transposed)
        min_sq_to_2 = col_stage(tbase)         # min sq dist to target boundary
        min_sq_to_1 = col_stage(pbase)         # min sq dist to pred boundary
        d12 = jnp.sqrt(jnp.max(jnp.where(mask1, min_sq_to_2, 0.0)))
        d21 = jnp.sqrt(jnp.max(jnp.where(mask2, min_sq_to_1, 0.0)))
        # TODO(synk): scipy's directed_hausdorff returns inf when the opposing
        # point set is empty; the _BIG sentinel yields ~1e9 instead of inf.
        hd = jnp.maximum(d12, d21)
        res = jnp.where(lane == g, hd, res)

    out_ref[...] = res.reshape(1, 1, G).astype(out_ref.dtype)


# -------------------------------- wrapper ----------------------------------- #
def hausdorff_distance_loss(output, target):
    """Mean symmetric Hausdorff distance over the batch (module forward)."""
    B, C, H, W = output.shape
    out_dtype = output.dtype
    target = target.astype(jnp.int32)
    # NOTE: logits stay in their input dtype (no astype(f32)) -> less HBM
    # traffic for bf16 inputs; argmax compares run in that dtype.

    # Lane-pack G images per grid step (G*W <= 128, G | B).
    G = max(1, min(B, 128 // max(W, 1)))
    while B % G:
        G -= 1
    NB = B // G
    GW = G * W

    # Wrapper-side layout plumbing: image g of a group occupies lanes
    # [g*W, (g+1)*W) of the packed strip.
    logits_p = jnp.transpose(
        output.reshape(NB, G, C, H, W), (0, 2, 3, 1, 4)).reshape(NB, C, H, GW)
    target_p = jnp.transpose(
        target.reshape(NB, G, H, W), (0, 2, 1, 3)).reshape(NB, H, GW)

    per_group = pl.pallas_call(
        functools.partial(_hausdorff_kernel, G=G, W=W),
        out_shape=jax.ShapeDtypeStruct((NB, 1, G), jnp.float32),
        grid_spec=pltpu.PrefetchScalarGridSpec(
            num_scalar_prefetch=0,
            grid=(NB,),
            in_specs=[
                pl.BlockSpec((1, C, H, GW), lambda n: (n, 0, 0, 0)),
                pl.BlockSpec((1, H, GW), lambda n: (n, 0, 0)),
            ],
            out_specs=pl.BlockSpec((1, 1, G), lambda n: (n, 0, 0)),
        ),
        compiler_params=pltpu.CompilerParams(
            dimension_semantics=("parallel",)),
    )(logits_p, target_p)

    per_image = per_group.reshape(B)
    return per_image.mean().astype(out_dtype)


# -------------------------- numpy reference (check) ------------------------- #
def _np_extract_boundaries(image):
    boundaries = np.zeros_like(image)
    for value in np.unique(image):
        if value == 0:
            continue
        mask = image == value
        boundary = np.zeros_like(mask)
        boundary[:-1, :] |= mask[:-1, :] != mask[1:, :]
        boundary[1:, :] |= mask[:-1, :] != mask[1:, :]
        boundary[:, :-1] |= mask[:, :-1] != mask[:, 1:]
        boundary[:, 1:] |= mask[:, :-1] != mask[:, 1:]
        boundaries[boundary] = value
    return boundaries


def _np_directed_hausdorff(p1, p2):
    if p1.shape[0] == 0:
        return 0.0
    if p2.shape[0] == 0:
        return np.inf
    d = np.sqrt(((p1[:, None, :].astype(np.float64)
                  - p2[None, :, :].astype(np.float64)) ** 2).sum(-1))
    return float(d.min(axis=1).max())


def _np_reference(output, target):
    vals = []
    for i in range(output.shape[0]):
        pred = np.argmax(output[i], axis=0)
        b1 = _np_extract_boundaries(pred)
        b2 = _np_extract_boundaries(target[i])
        p1 = np.column_stack(np.where(b1 > 0))
        p2 = np.column_stack(np.where(b2 > 0))
        vals.append(max(_np_directed_hausdorff(p1, p2),
                        _np_directed_hausdorff(p2, p1)))
    return float(np.mean(vals))


# ---------------------------------- main ------------------------------------ #
if __name__ == "__main__":
    key = jax.random.PRNGKey(0)
    k1, k2 = jax.random.split(key)
    B, C, H, W = 2, 4, 16, 16
    output = jax.random.normal(k1, (B, C, H, W), dtype=jnp.float32)
    target = jax.random.randint(k2, (B, H, W), 0, C, dtype=jnp.int32)

    loss = jax.jit(hausdorff_distance_loss)(output, target)
    loss = jax.block_until_ready(loss)

    ref = _np_reference(np.asarray(output), np.asarray(target))
    assert np.allclose(float(loss), ref, rtol=1e-5, atol=1e-5), (float(loss), ref)
    print("KERNEL_OK")
</pallas_src>

<mosaic_0001>
module attributes {stable_mosaic.version = 11 : i64} {
  func.func @_hausdorff_kernel(%arg0: i32, %arg1: memref<1x4x16x32xf32, #tpu.memory_space<vmem>>, %arg2: memref<1x16x32xi32, #tpu.memory_space<vmem>>, %arg3: memref<1x1x2xf32, #tpu.memory_space<vmem>>) attributes {dimension_semantics = [#tpu.dimension_semantics<parallel>], iteration_bounds = array<i64: 1>, scalar_prefetch = 0 : i64, scratch_operands = 0 : i64, tpu.core_type = #tpu.core_type<tc>, window_params = [{transform_indices = @transform_0, window_bounds = array<i64: 1, 4, 16, 32>}, {transform_indices = @transform_1, window_bounds = array<i64: 1, 16, 32>}, {transform_indices = @transform_2, window_bounds = array<i64: 1, 1, 2>}]} {
    %c0 = arith.constant 0 : index
    %c0_0 = arith.constant 0 : index
    %c0_1 = arith.constant 0 : index
    %c0_2 = arith.constant 0 : index
    %0 = vector.load %arg1[%c0, %c0_0, %c0_1, %c0_2] : memref<1x4x16x32xf32, #tpu.memory_space<vmem>>, vector<1x1x16x32xf32>
    %1 = vector.shape_cast %0 : vector<1x1x16x32xf32> to vector<16x32xf32>
    %c0_i32 = arith.constant 0 : i32
    %2 = vector.broadcast %c0_i32 : i32 to vector<16x32xi32>
    %c0_3 = arith.constant 0 : index
    %c1 = arith.constant 1 : index
    %c0_4 = arith.constant 0 : index
    %c0_5 = arith.constant 0 : index
    %3 = vector.load %arg1[%c0_3, %c1, %c0_4, %c0_5] : memref<1x4x16x32xf32, #tpu.memory_space<vmem>>, vector<1x1x16x32xf32>
    %4 = vector.shape_cast %3 : vector<1x1x16x32xf32> to vector<16x32xf32>
    %5 = arith.cmpf ogt, %4, %1 : vector<16x32xf32>
    %c1_i32 = arith.constant 1 : i32
    %6 = vector.broadcast %c1_i32 : i32 to vector<16x32xi32>
    %7 = arith.select %5, %6, %2 : vector<16x32xi1>, vector<16x32xi32>
    %8 = arith.select %5, %4, %1 : vector<16x32xi1>, vector<16x32xf32>
    %c0_6 = arith.constant 0 : index
    %c2 = arith.constant 2 : index
    %c0_7 = arith.constant 0 : index
    %c0_8 = arith.constant 0 : index
    %9 = vector.load %arg1[%c0_6, %c2, %c0_7, %c0_8] : memref<1x4x16x32xf32, #tpu.memory_space<vmem>>, vector<1x1x16x32xf32>
    %10 = vector.shape_cast %9 : vector<1x1x16x32xf32> to vector<16x32xf32>
    %11 = arith.cmpf ogt, %10, %8 : vector<16x32xf32>
    %c2_i32 = arith.constant 2 : i32
    %12 = vector.broadcast %c2_i32 : i32 to vector<16x32xi32>
    %13 = arith.select %11, %12, %7 : vector<16x32xi1>, vector<16x32xi32>
    %14 = arith.select %11, %10, %8 : vector<16x32xi1>, vector<16x32xf32>
    %c0_9 = arith.constant 0 : index
    %c3 = arith.constant 3 : index
    %c0_10 = arith.constant 0 : index
    %c0_11 = arith.constant 0 : index
    %15 = vector.load %arg1[%c0_9, %c3, %c0_10, %c0_11] : memref<1x4x16x32xf32, #tpu.memory_space<vmem>>, vector<1x1x16x32xf32>
    %16 = vector.shape_cast %15 : vector<1x1x16x32xf32> to vector<16x32xf32>
    %17 = arith.cmpf ogt, %16, %14 : vector<16x32xf32>
    %c3_i32 = arith.constant 3 : i32
    %18 = vector.broadcast %c3_i32 : i32 to vector<16x32xi32>
    %19 = arith.select %17, %18, %13 : vector<16x32xi1>, vector<16x32xi32>
    %c0_12 = arith.constant 0 : index
    %c0_13 = arith.constant 0 : index
    %c0_14 = arith.constant 0 : index
    %20 = vector.load %arg2[%c0_12, %c0_13, %c0_14] : memref<1x16x32xi32, #tpu.memory_space<vmem>>, vector<1x16x32xi32>
    %21 = vector.shape_cast %20 : vector<1x16x32xi32> to vector<16x32xi32>
    %22 = tpu.concatenate %19, %21 in 1 : vector<16x32xi32>, vector<16x32xi32> -> vector<16x64xi32>
    %23 = tpu.iota {dimensions = array<i32: 1>} : vector<16x64xi32>
    %c0_i32_15 = arith.constant 0 : i32
    %24 = vector.broadcast %c0_i32_15 : i32 to vector<16x64xi32>
    %25 = arith.cmpi eq, %23, %24 : vector<16x64xi32>
    %c15_i32 = arith.constant 15 : i32
    %26 = vector.broadcast %c15_i32 : i32 to vector<16x64xi32>
    %27 = arith.cmpi eq, %23, %26 : vector<16x64xi32>
    %c16_i32 = arith.constant 16 : i32
    %28 = vector.broadcast %c16_i32 : i32 to vector<16x64xi32>
    %29 = arith.cmpi eq, %23, %28 : vector<16x64xi32>
    %30 = arith.ori %25, %29 : vector<16x64xi1>
    %c31_i32 = arith.constant 31 : i32
    %31 = vector.broadcast %c31_i32 : i32 to vector<16x64xi32>
    %32 = arith.cmpi eq, %23, %31 : vector<16x64xi32>
    %33 = arith.ori %27, %32 : vector<16x64xi1>
    %c32_i32 = arith.constant 32 : i32
    %34 = vector.broadcast %c32_i32 : i32 to vector<16x64xi32>
    %35 = arith.cmpi eq, %23, %34 : vector<16x64xi32>
    %36 = arith.ori %30, %35 : vector<16x64xi1>
    %c47_i32 = arith.constant 47 : i32
    %37 = vector.broadcast %c47_i32 : i32 to vector<16x64xi32>
    %38 = arith.cmpi eq, %23, %37 : vector<16x64xi32>
    %39 = arith.ori %33, %38 : vector<16x64xi1>
    %c48_i32 = arith.constant 48 : i32
    %40 = vector.broadcast %c48_i32 : i32 to vector<16x64xi32>
    %41 = arith.cmpi eq, %23, %40 : vector<16x64xi32>
    %42 = arith.ori %36, %41 : vector<16x64xi1>
    %c63_i32 = arith.constant 63 : i32
    %43 = vector.broadcast %c63_i32 : i32 to vector<16x64xi32>
    %44 = arith.cmpi eq, %23, %43 : vector<16x64xi32>
    %45 = arith.ori %39, %44 : vector<16x64xi1>
    %cst = arith.constant dense<true> : vector<16x64xi1>
    %46 = arith.xori %42, %cst : vector<16x64xi1>
    %cst_16 = arith.constant dense<true> : vector<16x64xi1>
    %47 = arith.xori %45, %cst_16 : vector<16x64xi1>
    %48 = vector.extract_strided_slice %22 {offsets = [0, 0], sizes = [1, 64], strides = [1, 1]} : vector<16x64xi32> to vector<1x64xi32>
    %49 = vector.extract_strided_slice %22 {offsets = [0, 0], sizes = [15, 64], strides = [1, 1]} : vector<16x64xi32> to vector<15x64xi32>
    %50 = tpu.concatenate %48, %49 in 0 : vector<1x64xi32>, vector<15x64xi32> -> vector<16x64xi32>
    %51 = vector.extract_strided_slice %22 {offsets = [1, 0], sizes = [15, 64], strides = [1, 1]} : vector<16x64xi32> to vector<15x64xi32>
    %52 = vector.extract_strided_slice %22 {offsets = [15, 0], sizes = [1, 64], strides = [1, 1]} : vector<16x64xi32> to vector<1x64xi32>
    %53 = tpu.concatenate %51, %52 in 0 : vector<15x64xi32>, vector<1x64xi32> -> vector<16x64xi32>
    %54 = vector.extract_strided_slice %22 {offsets = [0, 0], sizes = [16, 1], strides = [1, 1]} : vector<16x64xi32> to vector<16x1xi32>
    %55 = vector.extract_strided_slice %22 {offsets = [0, 0], sizes = [16, 63], strides = [1, 1]} : vector<16x64xi32> to vector<16x63xi32>
    %56 = tpu.concatenate %54, %55 in 1 : vector<16x1xi32>, vector<16x63xi32> -> vector<16x64xi32>
    %57 = vector.extract_strided_slice %22 {offsets = [0, 1], sizes = [16, 63], strides = [1, 1]} : vector<16x64xi32> to vector<16x63xi32>
    %58 = vector.extract_strided_slice %22 {offsets = [0, 63], sizes = [16, 1], strides = [1, 1]} : vector<16x64xi32> to vector<16x1xi32>
    %59 = tpu.concatenate %57, %58 in 1 : vector<16x63xi32>, vector<16x1xi32> -> vector<16x64xi32>
    %60 = arith.cmpi ne, %22, %50 : vector<16x64xi32>
    %61 = arith.cmpi ne, %22, %53 : vector<16x64xi32>
    %62 = arith.ori %60, %61 : vector<16x64xi1>
    %63 = arith.cmpi ne, %22, %56 : vector<16x64xi32>
    %64 = arith.andi %63, %46 : vector<16x64xi1>
    %65 = arith.ori %62, %64 : vector<16x64xi1>
    %66 = arith.cmpi ne, %22, %59 : vector<16x64xi32>
    %67 = arith.andi %66, %47 : vector<16x64xi1>
    %68 = arith.ori %65, %67 : vector<16x64xi1>
    %cst_17 = arith.constant 0.000000e+00 : f32
    %cst_18 = arith.constant 9.99999984E+17 : f32
    %69 = vector.broadcast %cst_17 : f32 to vector<16x64xf32>
    %70 = vector.broadcast %cst_18 : f32 to vector<16x64xf32>
    %71 = arith.select %68, %69, %70 : vector<16x64xi1>, vector<16x64xf32>
    %72 = tpu.iota {dimensions = array<i32: 0>} : vector<16x1xi32>
    %73 = arith.sitofp %72 : vector<16x1xi32> to vector<16x1xf32>
    %cst_19 = arith.constant 0.000000e+00 : f32
    %74 = vector.broadcast %cst_19 : f32 to vector<16x1xf32>
    %75 = arith.subf %73, %74 : vector<16x1xf32>
    %76 = arith.mulf %75, %75 : vector<16x1xf32>
    %77 = vector.extract_strided_slice %71 {offsets = [0, 0], sizes = [1, 64], strides = [1, 1]} : vector<16x64xf32> to vector<1x64xf32>
    %78 = vector.broadcast %76 : vector<16x1xf32> to vector<16x64xf32>
    %79 = vector.broadcast %77 : vector<1x64xf32> to vector<16x64xf32>
    %80 = arith.addf %78, %79 : vector<16x64xf32>
    %cst_20 = arith.constant 1.000000e+00 : f32
    %81 = vector.broadcast %cst_20 : f32 to vector<16x1xf32>
    %82 = arith.subf %73, %81 : vector<16x1xf32>
    %83 = arith.mulf %82, %82 : vector<16x1xf32>
    %84 = vector.extract_strided_slice %71 {offsets = [1, 0], sizes = [1, 64], strides = [1, 1]} : vector<16x64xf32> to vector<1x64xf32>
    %85 = vector.broadcast %83 : vector<16x1xf32> to vector<16x64xf32>
    %86 = vector.broadcast %84 : vector<1x64xf32> to vector<16x64xf32>
    %87 = arith.addf %85, %86 : vector<16x64xf32>
    %cst_21 = arith.constant 2.000000e+00 : f32
    %88 = vector.broadcast %cst_21 : f32 to vector<16x1xf32>
    %89 = arith.subf %73, %88 : vector<16x1xf32>
    %90 = arith.mulf %89, %89 : vector<16x1xf32>
    %91 = vector.extract_strided_slice %71 {offsets = [2, 0], sizes = [1, 64], strides = [1, 1]} : vector<16x64xf32> to vector<1x64xf32>
    %92 = vector.broadcast %90 : vector<16x1xf32> to vector<16x64xf32>
    %93 = vector.broadcast %91 : vector<1x64xf32> to vector<16x64xf32>
    %94 = arith.addf %92, %93 : vector<16x64xf32>
    %cst_22 = arith.constant 3.000000e+00 : f32
    %95 = vector.broadcast %cst_22 : f32 to vector<16x1xf32>
    %96 = arith.subf %73, %95 : vector<16x1xf32>
    %97 = arith.mulf %96, %96 : vector<16x1xf32>
    %98 = vector.extract_strided_slice %71 {offsets = [3, 0], sizes = [1, 64], strides = [1, 1]} : vector<16x64xf32> to vector<1x64xf32>
    %99 = vector.broadcast %97 : vector<16x1xf32> to vector<16x64xf32>
    %100 = vector.broadcast %98 : vector<1x64xf32> to vector<16x64xf32>
    %101 = arith.addf %99, %100 : vector<16x64xf32>
    %cst_23 = arith.constant 4.000000e+00 : f32
    %102 = vector.broadcast %cst_23 : f32 to vector<16x1xf32>
    %103 = arith.subf %73, %102 : vector<16x1xf32>
    %104 = arith.mulf %103, %103 : vector<16x1xf32>
    %105 = vector.extract_strided_slice %71 {offsets = [4, 0], sizes = [1, 64], strides = [1, 1]} : vector<16x64xf32> to vector<1x64xf32>
    %106 = vector.broadcast %104 : vector<16x1xf32> to vector<16x64xf32>
    %107 = vector.broadcast %105 : vector<1x64xf32> to vector<16x64xf32>
    %108 = arith.addf %106, %107 : vector<16x64xf32>
    %109 = arith.minimumf %80, %108 : vector<16x64xf32>
    %cst_24 = arith.constant 5.000000e+00 : f32
    %110 = vector.broadcast %cst_24 : f32 to vector<16x1xf32>
    %111 = arith.subf %73, %110 : vector<16x1xf32>
    %112 = arith.mulf %111, %111 : vector<16x1xf32>
    %113 = vector.extract_strided_slice %71 {offsets = [5, 0], sizes = [1, 64], strides = [1, 1]} : vector<16x64xf32> to vector<1x64xf32>
    %114 = vector.broadcast %112 : vector<16x1xf32> to vector<16x64xf32>
    %115 = vector.broadcast %113 : vector<1x64xf32> to vector<16x64xf32>
    %116 = arith.addf %114, %115 : vector<16x64xf32>
    %117 = arith.minimumf %87, %116 : vector<16x64xf32>
    %cst_25 = arith.constant 6.000000e+00 : f32
    %118 = vector.broadcast %cst_25 : f32 to vector<16x1xf32>
    %119 = arith.subf %73, %118 : vector<16x1xf32>
    %120 = arith.mulf %119, %119 : vector<16x1xf32>
    %121 = vector.extract_strided_slice %71 {offsets = [6, 0], sizes = [1, 64], strides = [1, 1]} : vector<16x64xf32> to vector<1x64xf32>
    %122 = vector.broadcast %120 : vector<16x1xf32> to vector<16x64xf32>
    %123 = vector.broadcast %121 : vector<1x64xf32> to vector<16x64xf32>
    %124 = arith.addf %122, %123 : vector<16x64xf32>
    %125 = arith.minimumf %94, %124 : vector<16x64xf32>
    %cst_26 = arith.constant 7.000000e+00 : f32
    %126 = vector.broadcast %cst_26 : f32 to vector<16x1xf32>
    %127 = arith.subf %73, %126 : vector<16x1xf32>
    %128 = arith.mulf %127, %127 : vector<16x1xf32>
    %129 = vector.extract_strided_slice %71 {offsets = [7, 0], sizes = [1, 64], strides = [1, 1]} : vector<16x64xf32> to vector<1x64xf32>
    %130 = vector.broadcast %128 : vector<16x1xf32> to vector<16x64xf32>
    %131 = vector.broadcast %129 : vector<1x64xf32> to vector<16x64xf32>
    %132 = arith.addf %130, %131 : vector<16x64xf32>
    %133 = arith.minimumf %101, %132 : vector<16x64xf32>
    %cst_27 = arith.constant 8.000000e+00 : f32
    %134 = vector.broadcast %cst_27 : f32 to vector<16x1xf32>
    %135 = arith.subf %73, %134 : vector<16x1xf32>
    %136 = arith.mulf %135, %135 : vector<16x1xf32>
    %137 = vector.extract_strided_slice %71 {offsets = [8, 0], sizes = [1, 64], strides = [1, 1]} : vector<16x64xf32> to vector<1x64xf32>
    %138 = vector.broadcast %136 : vector<16x1xf32> to vector<16x64xf32>
    %139 = vector.broadcast %137 : vector<1x64xf32> to vector<16x64xf32>
    %140 = arith.addf %138, %139 : vector<16x64xf32>
    %141 = arith.minimumf %109, %140 : vector<16x64xf32>
    %cst_28 = arith.constant 9.000000e+00 : f32
    %142 = vector.broadcast %cst_28 : f32 to vector<16x1xf32>
    %143 = arith.subf %73, %142 : vector<16x1xf32>
    %144 = arith.mulf %143, %143 : vector<16x1xf32>
    %145 = vector.extract_strided_slice %71 {offsets = [9, 0], sizes = [1, 64], strides = [1, 1]} : vector<16x64xf32> to vector<1x64xf32>
    %146 = vector.broadcast %144 : vector<16x1xf32> to vector<16x64xf32>
    %147 = vector.broadcast %145 : vector<1x64xf32> to vector<16x64xf32>
    %148 = arith.addf %146, %147 : vector<16x64xf32>
    %149 = arith.minimumf %117, %148 : vector<16x64xf32>
    %cst_29 = arith.constant 1.000000e+01 : f32
    %150 = vector.broadcast %cst_29 : f32 to vector<16x1xf32>
    %151 = arith.subf %73, %150 : vector<16x1xf32>
    %152 = arith.mulf %151, %151 : vector<16x1xf32>
    %153 = vector.extract_strided_slice %71 {offsets = [10, 0], sizes = [1, 64], strides = [1, 1]} : vector<16x64xf32> to vector<1x64xf32>
    %154 = vector.broadcast %152 : vector<16x1xf32> to vector<16x64xf32>
    %155 = vector.broadcast %153 : vector<1x64xf32> to vector<16x64xf32>
    %156 = arith.addf %154, %155 : vector<16x64xf32>
    %157 = arith.minimumf %125, %156 : vector<16x64xf32>
    %cst_30 = arith.constant 1.100000e+01 : f32
    %158 = vector.broadcast %cst_30 : f32 to vector<16x1xf32>
    %159 = arith.subf %73, %158 : vector<16x1xf32>
    %160 = arith.mulf %159, %159 : vector<16x1xf32>
    %161 = vector.extract_strided_slice %71 {offsets = [11, 0], sizes = [1, 64], strides = [1, 1]} : vector<16x64xf32> to vector<1x64xf32>
    %162 = vector.broadcast %160 : vector<16x1xf32> to vector<16x64xf32>
    %163 = vector.broadcast %161 : vector<1x64xf32> to vector<16x64xf32>
    %164 = arith.addf %162, %163 : vector<16x64xf32>
    %165 = arith.minimumf %133, %164 : vector<16x64xf32>
    %cst_31 = arith.constant 1.200000e+01 : f32
    %166 = vector.broadcast %cst_31 : f32 to vector<16x1xf32>
    %167 = arith.subf %73, %166 : vector<16x1xf32>
    %168 = arith.mulf %167, %167 : vector<16x1xf32>
    %169 = vector.extract_strided_slice %71 {offsets = [12, 0], sizes = [1, 64], strides = [1, 1]} : vector<16x64xf32> to vector<1x64xf32>
    %170 = vector.broadcast %168 : vector<16x1xf32> to vector<16x64xf32>
    %171 = vector.broadcast %169 : vector<1x64xf32> to vector<16x64xf32>
    %172 = arith.addf %170, %171 : vector<16x64xf32>
    %173 = arith.minimumf %141, %172 : vector<16x64xf32>
    %cst_32 = arith.constant 1.300000e+01 : f32
    %174 = vector.broadcast %cst_32 : f32 to vector<16x1xf32>
    %175 = arith.subf %73, %174 : vector<16x1xf32>
    %176 = arith.mulf %175, %175 : vector<16x1xf32>
    %177 = vector.extract_strided_slice %71 {offsets = [13, 0], sizes = [1, 64], strides = [1, 1]} : vector<16x64xf32> to vector<1x64xf32>
    %178 = vector.broadcast %176 : vector<16x1xf32> to vector<16x64xf32>
    %179 = vector.broadcast %177 : vector<1x64xf32> to vector<16x64xf32>
    %180 = arith.addf %178, %179 : vector<16x64xf32>
    %181 = arith.minimumf %149, %180 : vector<16x64xf32>
    %cst_33 = arith.constant 1.400000e+01 : f32
    %182 = vector.broadcast %cst_33 : f32 to vector<16x1xf32>
    %183 = arith.subf %73, %182 : vector<16x1xf32>
    %184 = arith.mulf %183, %183 : vector<16x1xf32>
    %185 = vector.extract_strided_slice %71 {offsets = [14, 0], sizes = [1, 64], strides = [1, 1]} : vector<16x64xf32> to vector<1x64xf32>
    %186 = vector.broadcast %184 : vector<16x1xf32> to vector<16x64xf32>
    %187 = vector.broadcast %185 : vector<1x64xf32> to vector<16x64xf32>
    %188 = arith.addf %186, %187 : vector<16x64xf32>
    %189 = arith.minimumf %157, %188 : vector<16x64xf32>
    %cst_34 = arith.constant 1.500000e+01 : f32
    %190 = vector.broadcast %cst_34 : f32 to vector<16x1xf32>
    %191 = arith.subf %73, %190 : vector<16x1xf32>
    %192 = arith.mulf %191, %191 : vector<16x1xf32>
    %193 = vector.extract_strided_slice %71 {offsets = [15, 0], sizes = [1, 64], strides = [1, 1]} : vector<16x64xf32> to vector<1x64xf32>
    %194 = vector.broadcast %192 : vector<16x1xf32> to vector<16x64xf32>
    %195 = vector.broadcast %193 : vector<1x64xf32> to vector<16x64xf32>
    %196 = arith.addf %194, %195 : vector<16x64xf32>
    %197 = arith.minimumf %165, %196 : vector<16x64xf32>
    %198 = arith.minimumf %173, %181 : vector<16x64xf32>
    %199 = arith.minimumf %189, %197 : vector<16x64xf32>
    %200 = arith.minimumf %198, %199 : vector<16x64xf32>
    %201 = tpu.transpose %200, [1, 0] : vector<16x64xf32> -> vector<64x16xf32>
    %202 = tpu.iota {dimensions = array<i32: 0>} : vector<16x1xi32>
    %203 = arith.sitofp %202 : vector<16x1xi32> to vector<16x1xf32>
    %204 = tpu.iota {dimensions = array<i32: 1>} : vector<1x2xi32>
    %cst_35 = arith.constant 0.000000e+00 : f32
    %205 = vector.broadcast %cst_35 : f32 to vector<1x2xf32>
    %206 = vector.extract_strided_slice %201 {offsets = [0, 0], sizes = [16, 16], strides = [1, 1]} : vector<64x16xf32> to vector<16x16xf32>
    %cst_36 = arith.constant 5.000000e-01 : f32
    %207 = vector.broadcast %cst_36 : f32 to vector<16x16xf32>
    %208 = arith.cmpf olt, %206, %207 : vector<16x16xf32>
    %209 = vector.extract_strided_slice %201 {offsets = [32, 0], sizes = [16, 16], strides = [1, 1]} : vector<64x16xf32> to vector<16x16xf32>
    %cst_37 = arith.constant 5.000000e-01 : f32
    %210 = vector.broadcast %cst_37 : f32 to vector<16x16xf32>
    %211 = arith.cmpf olt, %209, %210 : vector<16x16xf32>
    %cst_38 = arith.constant 0.000000e+00 : f32
    %212 = vector.broadcast %cst_38 : f32 to vector<16x1xf32>
    %213 = arith.subf %203, %212 : vector<16x1xf32>
    %214 = arith.mulf %213, %213 : vector<16x1xf32>
    %215 = vector.extract_strided_slice %201 {offsets = [32, 0], sizes = [1, 16], strides = [1, 1]} : vector<64x16xf32> to vector<1x16xf32>
    %216 = vector.broadcast %214 : vector<16x1xf32> to vector<16x16xf32>
    %217 = vector.broadcast %215 : vector<1x16xf32> to vector<16x16xf32>
    %218 = arith.addf %216, %217 : vector<16x16xf32>
    %cst_39 = arith.constant 1.000000e+00 : f32
    %219 = vector.broadcast %cst_39 : f32 to vector<16x1xf32>
    %220 = arith.subf %203, %219 : vector<16x1xf32>
    %221 = arith.mulf %220, %220 : vector<16x1xf32>
    %222 = vector.extract_strided_slice %201 {offsets = [33, 0], sizes = [1, 16], strides = [1, 1]} : vector<64x16xf32> to vector<1x16xf32>
    %223 = vector.broadcast %221 : vector<16x1xf32> to vector<16x16xf32>
    %224 = vector.broadcast %222 : vector<1x16xf32> to vector<16x16xf32>
    %225 = arith.addf %223, %224 : vector<16x16xf32>
    %cst_40 = arith.constant 2.000000e+00 : f32
    %226 = vector.broadcast %cst_40 : f32 to vector<16x1xf32>
    %227 = arith.subf %203, %226 : vector<16x1xf32>
    %228 = arith.mulf %227, %227 : vector<16x1xf32>
    %229 = vector.extract_strided_slice %201 {offsets = [34, 0], sizes = [1, 16], strides = [1, 1]} : vector<64x16xf32> to vector<1x16xf32>
    %230 = vector.broadcast %228 : vector<16x1xf32> to vector<16x16xf32>
    %231 = vector.broadcast %229 : vector<1x16xf32> to vector<16x16xf32>
    %232 = arith.addf %230, %231 : vector<16x16xf32>
    %cst_41 = arith.constant 3.000000e+00 : f32
    %233 = vector.broadcast %cst_41 : f32 to vector<16x1xf32>
    %234 = arith.subf %203, %233 : vector<16x1xf32>
    %235 = arith.mulf %234, %234 : vector<16x1xf32>
    %236 = vector.extract_strided_slice %201 {offsets = [35, 0], sizes = [1, 16], strides = [1, 1]} : vector<64x16xf32> to vector<1x16xf32>
    %237 = vector.broadcast %235 : vector<16x1xf32> to vector<16x16xf32>
    %238 = vector.broadcast %236 : vector<1x16xf32> to vector<16x16xf32>
    %239 = arith.addf %237, %238 : vector<16x16xf32>
    %cst_42 = arith.constant 4.000000e+00 : f32
    %240 = vector.broadcast %cst_42 : f32 to vector<16x1xf32>
    %241 = arith.subf %203, %240 : vector<16x1xf32>
    %242 = arith.mulf %241, %241 : vector<16x1xf32>
    %243 = vector.extract_strided_slice %201 {offsets = [36, 0], sizes = [1, 16], strides = [1, 1]} : vector<64x16xf32> to vector<1x16xf32>
    %244 = vector.broadcast %242 : vector<16x1xf32> to vector<16x16xf32>
    %245 = vector.broadcast %243 : vector<1x16xf32> to vector<16x16xf32>
    %246 = arith.addf %244, %245 : vector<16x16xf32>
    %247 = arith.minimumf %218, %246 : vector<16x16xf32>
    %cst_43 = arith.constant 5.000000e+00 : f32
    %248 = vector.broadcast %cst_43 : f32 to vector<16x1xf32>
    %249 = arith.subf %203, %248 : vector<16x1xf32>
    %250 = arith.mulf %249, %249 : vector<16x1xf32>
    %251 = vector.extract_strided_slice %201 {offsets = [37, 0], sizes = [1, 16], strides = [1, 1]} : vector<64x16xf32> to vector<1x16xf32>
    %252 = vector.broadcast %250 : vector<16x1xf32> to vector<16x16xf32>
    %253 = vector.broadcast %251 : vector<1x16xf32> to vector<16x16xf32>
    %254 = arith.addf %252, %253 : vector<16x16xf32>
    %255 = arith.minimumf %225, %254 : vector<16x16xf32>
    %cst_44 = arith.constant 6.000000e+00 : f32
    %256 = vector.broadcast %cst_44 : f32 to vector<16x1xf32>
    %257 = arith.subf %203, %256 : vector<16x1xf32>
    %258 = arith.mulf %257, %257 : vector<16x1xf32>
    %259 = vector.extract_strided_slice %201 {offsets = [38, 0], sizes = [1, 16], strides = [1, 1]} : vector<64x16xf32> to vector<1x16xf32>
    %260 = vector.broadcast %258 : vector<16x1xf32> to vector<16x16xf32>
    %261 = vector.broadcast %259 : vector<1x16xf32> to vector<16x16xf32>
    %262 = arith.addf %260, %261 : vector<16x16xf32>
    %263 = arith.minimumf %232, %262 : vector<16x16xf32>
    %cst_45 = arith.constant 7.000000e+00 : f32
    %264 = vector.broadcast %cst_45 : f32 to vector<16x1xf32>
    %265 = arith.subf %203, %264 : vector<16x1xf32>
    %266 = arith.mulf %265, %265 : vector<16x1xf32>
    %267 = vector.extract_strided_slice %201 {offsets = [39, 0], sizes = [1, 16], strides = [1, 1]} : vector<64x16xf32> to vector<1x16xf32>
    %268 = vector.broadcast %266 : vector<16x1xf32> to vector<16x16xf32>
    %269 = vector.broadcast %267 : vector<1x16xf32> to vector<16x16xf32>
    %270 = arith.addf %268, %269 : vector<16x16xf32>
    %271 = arith.minimumf %239, %270 : vector<16x16xf32>
    %cst_46 = arith.constant 8.000000e+00 : f32
    %272 = vector.broadcast %cst_46 : f32 to vector<16x1xf32>
    %273 = arith.subf %203, %272 : vector<16x1xf32>
    %274 = arith.mulf %273, %273 : vector<16x1xf32>
    %275 = vector.extract_strided_slice %201 {offsets = [40, 0], sizes = [1, 16], strides = [1, 1]} : vector<64x16xf32> to vector<1x16xf32>
    %276 = vector.broadcast %274 : vector<16x1xf32> to vector<16x16xf32>
    %277 = vector.broadcast %275 : vector<1x16xf32> to vector<16x16xf32>
    %278 = arith.addf %276, %277 : vector<16x16xf32>
    %279 = arith.minimumf %247, %278 : vector<16x16xf32>
    %cst_47 = arith.constant 9.000000e+00 : f32
    %280 = vector.broadcast %cst_47 : f32 to vector<16x1xf32>
    %281 = arith.subf %203, %280 : vector<16x1xf32>
    %282 = arith.mulf %281, %281 : vector<16x1xf32>
    %283 = vector.extract_strided_slice %201 {offsets = [41, 0], sizes = [1, 16], strides = [1, 1]} : vector<64x16xf32> to vector<1x16xf32>
    %284 = vector.broadcast %282 : vector<16x1xf32> to vector<16x16xf32>
    %285 = vector.broadcast %283 : vector<1x16xf32> to vector<16x16xf32>
    %286 = arith.addf %284, %285 : vector<16x16xf32>
    %287 = arith.minimumf %255, %286 : vector<16x16xf32>
    %cst_48 = arith.constant 1.000000e+01 : f32
    %288 = vector.broadcast %cst_48 : f32 to vector<16x1xf32>
    %289 = arith.subf %203, %288 : vector<16x1xf32>
    %290 = arith.mulf %289, %289 : vector<16x1xf32>
    %291 = vector.extract_strided_slice %201 {offsets = [42, 0], sizes = [1, 16], strides = [1, 1]} : vector<64x16xf32> to vector<1x16xf32>
    %292 = vector.broadcast %290 : vector<16x1xf32> to vector<16x16xf32>
    %293 = vector.broadcast %291 : vector<1x16xf32> to vector<16x16xf32>
    %294 = arith.addf %292, %293 : vector<16x16xf32>
    %295 = arith.minimumf %263, %294 : vector<16x16xf32>
    %cst_49 = arith.constant 1.100000e+01 : f32
    %296 = vector.broadcast %cst_49 : f32 to vector<16x1xf32>
    %297 = arith.subf %203, %296 : vector<16x1xf32>
    %298 = arith.mulf %297, %297 : vector<16x1xf32>
    %299 = vector.extract_strided_slice %201 {offsets = [43, 0], sizes = [1, 16], strides = [1, 1]} : vector<64x16xf32> to vector<1x16xf32>
    %300 = vector.broadcast %298 : vector<16x1xf32> to vector<16x16xf32>
    %301 = vector.broadcast %299 : vector<1x16xf32> to vector<16x16xf32>
    %302 = arith.addf %300, %301 : vector<16x16xf32>
    %303 = arith.minimumf %271, %302 : vector<16x16xf32>
    %cst_50 = arith.constant 1.200000e+01 : f32
    %304 = vector.broadcast %cst_50 : f32 to vector<16x1xf32>
    %305 = arith.subf %203, %304 : vector<16x1xf32>
    %306 = arith.mulf %305, %305 : vector<16x1xf32>
    %307 = vector.extract_strided_slice %201 {offsets = [44, 0], sizes = [1, 16], strides = [1, 1]} : vector<64x16xf32> to vector<1x16xf32>
    %308 = vector.broadcast %306 : vector<16x1xf32> to vector<16x16xf32>
    %309 = vector.broadcast %307 : vector<1x16xf32> to vector<16x16xf32>
    %310 = arith.addf %308, %309 : vector<16x16xf32>
    %311 = arith.minimumf %279, %310 : vector<16x16xf32>
    %cst_51 = arith.constant 1.300000e+01 : f32
    %312 = vector.broadcast %cst_51 : f32 to vector<16x1xf32>
    %313 = arith.subf %203, %312 : vector<16x1xf32>
    %314 = arith.mulf %313, %313 : vector<16x1xf32>
    %315 = vector.extract_strided_slice %201 {offsets = [45, 0], sizes = [1, 16], strides = [1, 1]} : vector<64x16xf32> to vector<1x16xf32>
    %316 = vector.broadcast %314 : vector<16x1xf32> to vector<16x16xf32>
    %317 = vector.broadcast %315 : vector<1x16xf32> to vector<16x16xf32>
    %318 = arith.addf %316, %317 : vector<16x16xf32>
    %319 = arith.minimumf %287, %318 : vector<16x16xf32>
    %cst_52 = arith.constant 1.400000e+01 : f32
    %320 = vector.broadcast %cst_52 : f32 to vector<16x1xf32>
    %321 = arith.subf %203, %320 : vector<16x1xf32>
    %322 = arith.mulf %321, %321 : vector<16x1xf32>
    %323 = vector.extract_strided_slice %201 {offsets = [46, 0], sizes = [1, 16], strides = [1, 1]} : vector<64x16xf32> to vector<1x16xf32>
    %324 = vector.broadcast %322 : vector<16x1xf32> to vector<16x16xf32>
    %325 = vector.broadcast %323 : vector<1x16xf32> to vector<16x16xf32>
    %326 = arith.addf %324, %325 : vector<16x16xf32>
    %327 = arith.minimumf %295, %326 : vector<16x16xf32>
    %cst_53 = arith.constant 1.500000e+01 : f32
    %328 = vector.broadcast %cst_53 : f32 to vector<16x1xf32>
    %329 = arith.subf %203, %328 : vector<16x1xf32>
    %330 = arith.mulf %329, %329 : vector<16x1xf32>
    %331 = vector.extract_strided_slice %201 {offsets = [47, 0], sizes = [1, 16], strides = [1, 1]} : vector<64x16xf32> to vector<1x16xf32>
    %332 = vector.broadcast %330 : vector<16x1xf32> to vector<16x16xf32>
    %333 = vector.broadcast %331 : vector<1x16xf32> to vector<16x16xf32>
    %334 = arith.addf %332, %333 : vector<16x16xf32>
    %335 = arith.minimumf %303, %334 : vector<16x16xf32>
    %336 = arith.minimumf %311, %319 : vector<16x16xf32>
    %337 = arith.minimumf %327, %335 : vector<16x16xf32>
    %338 = arith.minimumf %336, %337 : vector<16x16xf32>
    %cst_54 = arith.constant 0.000000e+00 : f32
    %339 = vector.broadcast %cst_54 : f32 to vector<16x1xf32>
    %340 = arith.subf %203, %339 : vector<16x1xf32>
    %341 = arith.mulf %340, %340 : vector<16x1xf32>
    %342 = vector.extract_strided_slice %201 {offsets = [0, 0], sizes = [1, 16], strides = [1, 1]} : vector<64x16xf32> to vector<1x16xf32>
    %343 = vector.broadcast %341 : vector<16x1xf32> to vector<16x16xf32>
    %344 = vector.broadcast %342 : vector<1x16xf32> to vector<16x16xf32>
    %345 = arith.addf %343, %344 : vector<16x16xf32>
    %cst_55 = arith.constant 1.000000e+00 : f32
    %346 = vector.broadcast %cst_55 : f32 to vector<16x1xf32>
    %347 = arith.subf %203, %346 : vector<16x1xf32>
    %348 = arith.mulf %347, %347 : vector<16x1xf32>
    %349 = vector.extract_strided_slice %201 {offsets = [1, 0], sizes = [1, 16], strides = [1, 1]} : vector<64x16xf32> to vector<1x16xf32>
    %350 = vector.broadcast %348 : vector<16x1xf32> to vector<16x16xf32>
    %351 = vector.broadcast %349 : vector<1x16xf32> to vector<16x16xf32>
    %352 = arith.addf %350, %351 : vector<16x16xf32>
    %cst_56 = arith.constant 2.000000e+00 : f32
    %353 = vector.broadcast %cst_56 : f32 to vector<16x1xf32>
    %354 = arith.subf %203, %353 : vector<16x1xf32>
    %355 = arith.mulf %354, %354 : vector<16x1xf32>
    %356 = vector.extract_strided_slice %201 {offsets = [2, 0], sizes = [1, 16], strides = [1, 1]} : vector<64x16xf32> to vector<1x16xf32>
    %357 = vector.broadcast %355 : vector<16x1xf32> to vector<16x16xf32>
    %358 = vector.broadcast %356 : vector<1x16xf32> to vector<16x16xf32>
    %359 = arith.addf %357, %358 : vector<16x16xf32>
    %cst_57 = arith.constant 3.000000e+00 : f32
    %360 = vector.broadcast %cst_57 : f32 to vector<16x1xf32>
    %361 = arith.subf %203, %360 : vector<16x1xf32>
    %362 = arith.mulf %361, %361 : vector<16x1xf32>
    %363 = vector.extract_strided_slice %201 {offsets = [3, 0], sizes = [1, 16], strides = [1, 1]} : vector<64x16xf32> to vector<1x16xf32>
    %364 = vector.broadcast %362 : vector<16x1xf32> to vector<16x16xf32>
    %365 = vector.broadcast %363 : vector<1x16xf32> to vector<16x16xf32>
    %366 = arith.addf %364, %365 : vector<16x16xf32>
    %cst_58 = arith.constant 4.000000e+00 : f32
    %367 = vector.broadcast %cst_58 : f32 to vector<16x1xf32>
    %368 = arith.subf %203, %367 : vector<16x1xf32>
    %369 = arith.mulf %368, %368 : vector<16x1xf32>
    %370 = vector.extract_strided_slice %201 {offsets = [4, 0], sizes = [1, 16], strides = [1, 1]} : vector<64x16xf32> to vector<1x16xf32>
    %371 = vector.broadcast %369 : vector<16x1xf32> to vector<16x16xf32>
    %372 = vector.broadcast %370 : vector<1x16xf32> to vector<16x16xf32>
    %373 = arith.addf %371, %372 : vector<16x16xf32>
    %374 = arith.minimumf %345, %373 : vector<16x16xf32>
    %cst_59 = arith.constant 5.000000e+00 : f32
    %375 = vector.broadcast %cst_59 : f32 to vector<16x1xf32>
    %376 = arith.subf %203, %375 : vector<16x1xf32>
    %377 = arith.mulf %376, %376 : vector<16x1xf32>
    %378 = vector.extract_strided_slice %201 {offsets = [5, 0], sizes = [1, 16], strides = [1, 1]} : vector<64x16xf32> to vector<1x16xf32>
    %379 = vector.broadcast %377 : vector<16x1xf32> to vector<16x16xf32>
    %380 = vector.broadcast %378 : vector<1x16xf32> to vector<16x16xf32>
    %381 = arith.addf %379, %380 : vector<16x16xf32>
    %382 = arith.minimumf %352, %381 : vector<16x16xf32>
    %cst_60 = arith.constant 6.000000e+00 : f32
    %383 = vector.broadcast %cst_60 : f32 to vector<16x1xf32>
    %384 = arith.subf %203, %383 : vector<16x1xf32>
    %385 = arith.mulf %384, %384 : vector<16x1xf32>
    %386 = vector.extract_strided_slice %201 {offsets = [6, 0], sizes = [1, 16], strides = [1, 1]} : vector<64x16xf32> to vector<1x16xf32>
    %387 = vector.broadcast %385 : vector<16x1xf32> to vector<16x16xf32>
    %388 = vector.broadcast %386 : vector<1x16xf32> to vector<16x16xf32>
    %389 = arith.addf %387, %388 : vector<16x16xf32>
    %390 = arith.minimumf %359, %389 : vector<16x16xf32>
    %cst_61 = arith.constant 7.000000e+00 : f32
    %391 = vector.broadcast %cst_61 : f32 to vector<16x1xf32>
    %392 = arith.subf %203, %391 : vector<16x1xf32>
    %393 = arith.mulf %392, %392 : vector<16x1xf32>
    %394 = vector.extract_strided_slice %201 {offsets = [7, 0], sizes = [1, 16], strides = [1, 1]} : vector<64x16xf32> to vector<1x16xf32>
    %395 = vector.broadcast %393 : vector<16x1xf32> to vector<16x16xf32>
    %396 = vector.broadcast %394 : vector<1x16xf32> to vector<16x16xf32>
    %397 = arith.addf %395, %396 : vector<16x16xf32>
    %398 = arith.minimumf %366, %397 : vector<16x16xf32>
    %cst_62 = arith.constant 8.000000e+00 : f32
    %399 = vector.broadcast %cst_62 : f32 to vector<16x1xf32>
    %400 = arith.subf %203, %399 : vector<16x1xf32>
    %401 = arith.mulf %400, %400 : vector<16x1xf32>
    %402 = vector.extract_strided_slice %201 {offsets = [8, 0], sizes = [1, 16], strides = [1, 1]} : vector<64x16xf32> to vector<1x16xf32>
    %403 = vector.broadcast %401 : vector<16x1xf32> to vector<16x16xf32>
    %404 = vector.broadcast %402 : vector<1x16xf32> to vector<16x16xf32>
    %405 = arith.addf %403, %404 : vector<16x16xf32>
    %406 = arith.minimumf %374, %405 : vector<16x16xf32>
    %cst_63 = arith.constant 9.000000e+00 : f32
    %407 = vector.broadcast %cst_63 : f32 to vector<16x1xf32>
    %408 = arith.subf %203, %407 : vector<16x1xf32>
    %409 = arith.mulf %408, %408 : vector<16x1xf32>
    %410 = vector.extract_strided_slice %201 {offsets = [9, 0], sizes = [1, 16], strides = [1, 1]} : vector<64x16xf32> to vector<1x16xf32>
    %411 = vector.broadcast %409 : vector<16x1xf32> to vector<16x16xf32>
    %412 = vector.broadcast %410 : vector<1x16xf32> to vector<16x16xf32>
    %413 = arith.addf %411, %412 : vector<16x16xf32>
    %414 = arith.minimumf %382, %413 : vector<16x16xf32>
    %cst_64 = arith.constant 1.000000e+01 : f32
    %415 = vector.broadcast %cst_64 : f32 to vector<16x1xf32>
    %416 = arith.subf %203, %415 : vector<16x1xf32>
    %417 = arith.mulf %416, %416 : vector<16x1xf32>
    %418 = vector.extract_strided_slice %201 {offsets = [10, 0], sizes = [1, 16], strides = [1, 1]} : vector<64x16xf32> to vector<1x16xf32>
    %419 = vector.broadcast %417 : vector<16x1xf32> to vector<16x16xf32>
    %420 = vector.broadcast %418 : vector<1x16xf32> to vector<16x16xf32>
    %421 = arith.addf %419, %420 : vector<16x16xf32>
    %422 = arith.minimumf %390, %421 : vector<16x16xf32>
    %cst_65 = arith.constant 1.100000e+01 : f32
    %423 = vector.broadcast %cst_65 : f32 to vector<16x1xf32>
    %424 = arith.subf %203, %423 : vector<16x1xf32>
    %425 = arith.mulf %424, %424 : vector<16x1xf32>
    %426 = vector.extract_strided_slice %201 {offsets = [11, 0], sizes = [1, 16], strides = [1, 1]} : vector<64x16xf32> to vector<1x16xf32>
    %427 = vector.broadcast %425 : vector<16x1xf32> to vector<16x16xf32>
    %428 = vector.broadcast %426 : vector<1x16xf32> to vector<16x16xf32>
    %429 = arith.addf %427, %428 : vector<16x16xf32>
    %430 = arith.minimumf %398, %429 : vector<16x16xf32>
    %cst_66 = arith.constant 1.200000e+01 : f32
    %431 = vector.broadcast %cst_66 : f32 to vector<16x1xf32>
    %432 = arith.subf %203, %431 : vector<16x1xf32>
    %433 = arith.mulf %432, %432 : vector<16x1xf32>
    %434 = vector.extract_strided_slice %201 {offsets = [12, 0], sizes = [1, 16], strides = [1, 1]} : vector<64x16xf32> to vector<1x16xf32>
    %435 = vector.broadcast %433 : vector<16x1xf32> to vector<16x16xf32>
    %436 = vector.broadcast %434 : vector<1x16xf32> to vector<16x16xf32>
    %437 = arith.addf %435, %436 : vector<16x16xf32>
    %438 = arith.minimumf %406, %437 : vector<16x16xf32>
    %cst_67 = arith.constant 1.300000e+01 : f32
    %439 = vector.broadcast %cst_67 : f32 to vector<16x1xf32>
    %440 = arith.subf %203, %439 : vector<16x1xf32>
    %441 = arith.mulf %440, %440 : vector<16x1xf32>
    %442 = vector.extract_strided_slice %201 {offsets = [13, 0], sizes = [1, 16], strides = [1, 1]} : vector<64x16xf32> to vector<1x16xf32>
    %443 = vector.broadcast %441 : vector<16x1xf32> to vector<16x16xf32>
    %444 = vector.broadcast %442 : vector<1x16xf32> to vector<16x16xf32>
    %445 = arith.addf %443, %444 : vector<16x16xf32>
    %446 = arith.minimumf %414, %445 : vector<16x16xf32>
    %cst_68 = arith.constant 1.400000e+01 : f32
    %447 = vector.broadcast %cst_68 : f32 to vector<16x1xf32>
    %448 = arith.subf %203, %447 : vector<16x1xf32>
    %449 = arith.mulf %448, %448 : vector<16x1xf32>
    %450 = vector.extract_strided_slice %201 {offsets = [14, 0], sizes = [1, 16], strides = [1, 1]} : vector<64x16xf32> to vector<1x16xf32>
    %451 = vector.broadcast %449 : vector<16x1xf32> to vector<16x16xf32>
    %452 = vector.broadcast %450 : vector<1x16xf32> to vector<16x16xf32>
    %453 = arith.addf %451, %452 : vector<16x16xf32>
    %454 = arith.minimumf %422, %453 : vector<16x16xf32>
    %cst_69 = arith.constant 1.500000e+01 : f32
    %455 = vector.broadcast %cst_69 : f32 to vector<16x1xf32>
    %456 = arith.subf %203, %455 : vector<16x1xf32>
    %457 = arith.mulf %456, %456 : vector<16x1xf32>
    %458 = vector.extract_strided_slice %201 {offsets = [15, 0], sizes = [1, 16], strides = [1, 1]} : vector<64x16xf32> to vector<1x16xf32>
    %459 = vector.broadcast %457 : vector<16x1xf32> to vector<16x16xf32>
    %460 = vector.broadcast %458 : vector<1x16xf32> to vector<16x16xf32>
    %461 = arith.addf %459, %460 : vector<16x16xf32>
    %462 = arith.minimumf %430, %461 : vector<16x16xf32>
    %463 = arith.minimumf %438, %446 : vector<16x16xf32>
    %464 = arith.minimumf %454, %462 : vector<16x16xf32>
    %465 = arith.minimumf %463, %464 : vector<16x16xf32>
    %cst_70 = arith.constant 0.000000e+00 : f32
    %466 = vector.broadcast %cst_70 : f32 to vector<16x16xf32>
    %467 = arith.select %208, %338, %466 : vector<16x16xi1>, vector<16x16xf32>
    %468 = vector.shape_cast %467 : vector<16x16xf32> to vector<1x16x16xf32>
    %cst_71 = arith.constant dense<0xFF800000> : vector<1xf32>
    %469 = vector.multi_reduction <maximumf>, %468, %cst_71 [1, 2] : vector<1x16x16xf32> to vector<1xf32>
    %470 = vector.shape_cast %469 : vector<1xf32> to vector<1x1x1xf32>
    %471 = vector.extract %470[0, 0, 0] : f32 from vector<1x1x1xf32>
    %472 = math.sqrt %471 : f32
    %cst_72 = arith.constant 0.000000e+00 : f32
    %473 = vector.broadcast %cst_72 : f32 to vector<16x16xf32>
    %474 = arith.select %211, %465, %473 : vector<16x16xi1>, vector<16x16xf32>
    %475 = vector.shape_cast %474 : vector<16x16xf32> to vector<1x16x16xf32>
    %cst_73 = arith.constant dense<0xFF800000> : vector<1xf32>
    %476 = vector.multi_reduction <maximumf>, %475, %cst_73 [1, 2] : vector<1x16x16xf32> to vector<1xf32>
    %477 = vector.shape_cast %476 : vector<1xf32> to vector<1x1x1xf32>
    %478 = vector.extract %477[0, 0, 0] : f32 from vector<1x1x1xf32>
    %479 = math.sqrt %478 : f32
    %480 = arith.maximumf %472, %479 : f32
    %c0_i32_74 = arith.constant 0 : i32
    %481 = vector.broadcast %c0_i32_74 : i32 to vector<1x2xi32>
    %482 = arith.cmpi eq, %204, %481 : vector<1x2xi32>
    %483 = vector.broadcast %480 : f32 to vector<1x2xf32>
    %484 = arith.select %482, %483, %205 : vector<1x2xi1>, vector<1x2xf32>
    %485 = vector.extract_strided_slice %201 {offsets = [16, 0], sizes = [16, 16], strides = [1, 1]} : vector<64x16xf32> to vector<16x16xf32>
    %cst_75 = arith.constant 5.000000e-01 : f32
    %486 = vector.broadcast %cst_75 : f32 to vector<16x16xf32>
    %487 = arith.cmpf olt, %485, %486 : vector<16x16xf32>
    %488 = vector.extract_strided_slice %201 {offsets = [48, 0], sizes = [16, 16], strides = [1, 1]} : vector<64x16xf32> to vector<16x16xf32>
    %cst_76 = arith.constant 5.000000e-01 : f32
    %489 = vector.broadcast %cst_76 : f32 to vector<16x16xf32>
    %490 = arith.cmpf olt, %488, %489 : vector<16x16xf32>
    %cst_77 = arith.constant 0.000000e+00 : f32
    %491 = vector.broadcast %cst_77 : f32 to vector<16x1xf32>
    %492 = arith.subf %203, %491 : vector<16x1xf32>
    %493 = arith.mulf %492, %492 : vector<16x1xf32>
    %494 = vector.extract_strided_slice %201 {offsets = [48, 0], sizes = [1, 16], strides = [1, 1]} : vector<64x16xf32> to vector<1x16xf32>
    %495 = vector.broadcast %493 : vector<16x1xf32> to vector<16x16xf32>
    %496 = vector.broadcast %494 : vector<1x16xf32> to vector<16x16xf32>
    %497 = arith.addf %495, %496 : vector<16x16xf32>
    %cst_78 = arith.constant 1.000000e+00 : f32
    %498 = vector.broadcast %cst_78 : f32 to vector<16x1xf32>
    %499 = arith.subf %203, %498 : vector<16x1xf32>
    %500 = arith.mulf %499, %499 : vector<16x1xf32>
    %501 = vector.extract_strided_slice %201 {offsets = [49, 0], sizes = [1, 16], strides = [1, 1]} : vector<64x16xf32> to vector<1x16xf32>
    %502 = vector.broadcast %500 : vector<16x1xf32> to vector<16x16xf32>
    %503 = vector.broadcast %501 : vector<1x16xf32> to vector<16x16xf32>
    %504 = arith.addf %502, %503 : vector<16x16xf32>
    %cst_79 = arith.constant 2.000000e+00 : f32
    %505 = vector.broadcast %cst_79 : f32 to vector<16x1xf32>
    %506 = arith.subf %203, %505 : vector<16x1xf32>
    %507 = arith.mulf %506, %506 : vector<16x1xf32>
    %508 = vector.extract_strided_slice %201 {offsets = [50, 0], sizes = [1, 16], strides = [1, 1]} : vector<64x16xf32> to vector<1x16xf32>
    %509 = vector.broadcast %507 : vector<16x1xf32> to vector<16x16xf32>
    %510 = vector.broadcast %508 : vector<1x16xf32> to vector<16x16xf32>
    %511 = arith.addf %509, %510 : vector<16x16xf32>
    %cst_80 = arith.constant 3.000000e+00 : f32
    %512 = vector.broadcast %cst_80 : f32 to vector<16x1xf32>
    %513 = arith.subf %203, %512 : vector<16x1xf32>
    %514 = arith.mulf %513, %513 : vector<16x1xf32>
    %515 = vector.extract_strided_slice %201 {offsets = [51, 0], sizes = [1, 16], strides = [1, 1]} : vector<64x16xf32> to vector<1x16xf32>
    %516 = vector.broadcast %514 : vector<16x1xf32> to vector<16x16xf32>
    %517 = vector.broadcast %515 : vector<1x16xf32> to vector<16x16xf32>
    %518 = arith.addf %516, %517 : vector<16x16xf32>
    %cst_81 = arith.constant 4.000000e+00 : f32
    %519 = vector.broadcast %cst_81 : f32 to vector<16x1xf32>
    %520 = arith.subf %203, %519 : vector<16x1xf32>
    %521 = arith.mulf %520, %520 : vector<16x1xf32>
    %522 = vector.extract_strided_slice %201 {offsets = [52, 0], sizes = [1, 16], strides = [1, 1]} : vector<64x16xf32> to vector<1x16xf32>
    %523 = vector.broadcast %521 : vector<16x1xf32> to vector<16x16xf32>
    %524 = vector.broadcast %522 : vector<1x16xf32> to vector<16x16xf32>
    %525 = arith.addf %523, %524 : vector<16x16xf32>
    %526 = arith.minimumf %497, %525 : vector<16x16xf32>
    %cst_82 = arith.constant 5.000000e+00 : f32
    %527 = vector.broadcast %cst_82 : f32 to vector<16x1xf32>
    %528 = arith.subf %203, %527 : vector<16x1xf32>
    %529 = arith.mulf %528, %528 : vector<16x1xf32>
    %530 = vector.extract_strided_slice %201 {offsets = [53, 0], sizes = [1, 16], strides = [1, 1]} : vector<64x16xf32> to vector<1x16xf32>
    %531 = vector.broadcast %529 : vector<16x1xf32> to vector<16x16xf32>
    %532 = vector.broadcast %530 : vector<1x16xf32> to vector<16x16xf32>
    %533 = arith.addf %531, %532 : vector<16x16xf32>
    %534 = arith.minimumf %504, %533 : vector<16x16xf32>
    %cst_83 = arith.constant 6.000000e+00 : f32
    %535 = vector.broadcast %cst_83 : f32 to vector<16x1xf32>
    %536 = arith.subf %203, %535 : vector<16x1xf32>
    %537 = arith.mulf %536, %536 : vector<16x1xf32>
    %538 = vector.extract_strided_slice %201 {offsets = [54, 0], sizes = [1, 16], strides = [1, 1]} : vector<64x16xf32> to vector<1x16xf32>
    %539 = vector.broadcast %537 : vector<16x1xf32> to vector<16x16xf32>
    %540 = vector.broadcast %538 : vector<1x16xf32> to vector<16x16xf32>
    %541 = arith.addf %539, %540 : vector<16x16xf32>
    %542 = arith.minimumf %511, %541 : vector<16x16xf32>
    %cst_84 = arith.constant 7.000000e+00 : f32
    %543 = vector.broadcast %cst_84 : f32 to vector<16x1xf32>
    %544 = arith.subf %203, %543 : vector<16x1xf32>
    %545 = arith.mulf %544, %544 : vector<16x1xf32>
    %546 = vector.extract_strided_slice %201 {offsets = [55, 0], sizes = [1, 16], strides = [1, 1]} : vector<64x16xf32> to vector<1x16xf32>
    %547 = vector.broadcast %545 : vector<16x1xf32> to vector<16x16xf32>
    %548 = vector.broadcast %546 : vector<1x16xf32> to vector<16x16xf32>
    %549 = arith.addf %547, %548 : vector<16x16xf32>
    %550 = arith.minimumf %518, %549 : vector<16x16xf32>
    %cst_85 = arith.constant 8.000000e+00 : f32
    %551 = vector.broadcast %cst_85 : f32 to vector<16x1xf32>
    %552 = arith.subf %203, %551 : vector<16x1xf32>
    %553 = arith.mulf %552, %552 : vector<16x1xf32>
    %554 = vector.extract_strided_slice %201 {offsets = [56, 0], sizes = [1, 16], strides = [1, 1]} : vector<64x16xf32> to vector<1x16xf32>
    %555 = vector.broadcast %553 : vector<16x1xf32> to vector<16x16xf32>
    %556 = vector.broadcast %554 : vector<1x16xf32> to vector<16x16xf32>
    %557 = arith.addf %555, %556 : vector<16x16xf32>
    %558 = arith.minimumf %526, %557 : vector<16x16xf32>
    %cst_86 = arith.constant 9.000000e+00 : f32
    %559 = vector.broadcast %cst_86 : f32 to vector<16x1xf32>
    %560 = arith.subf %203, %559 : vector<16x1xf32>
    %561 = arith.mulf %560, %560 : vector<16x1xf32>
    %562 = vector.extract_strided_slice %201 {offsets = [57, 0], sizes = [1, 16], strides = [1, 1]} : vector<64x16xf32> to vector<1x16xf32>
    %563 = vector.broadcast %561 : vector<16x1xf32> to vector<16x16xf32>
    %564 = vector.broadcast %562 : vector<1x16xf32> to vector<16x16xf32>
    %565 = arith.addf %563, %564 : vector<16x16xf32>
    %566 = arith.minimumf %534, %565 : vector<16x16xf32>
    %cst_87 = arith.constant 1.000000e+01 : f32
    %567 = vector.broadcast %cst_87 : f32 to vector<16x1xf32>
    %568 = arith.subf %203, %567 : vector<16x1xf32>
    %569 = arith.mulf %568, %568 : vector<16x1xf32>
    %570 = vector.extract_strided_slice %201 {offsets = [58, 0], sizes = [1, 16], strides = [1, 1]} : vector<64x16xf32> to vector<1x16xf32>
    %571 = vector.broadcast %569 : vector<16x1xf32> to vector<16x16xf32>
    %572 = vector.broadcast %570 : vector<1x16xf32> to vector<16x16xf32>
    %573 = arith.addf %571, %572 : vector<16x16xf32>
    %574 = arith.minimumf %542, %573 : vector<16x16xf32>
    %cst_88 = arith.constant 1.100000e+01 : f32
    %575 = vector.broadcast %cst_88 : f32 to vector<16x1xf32>
    %576 = arith.subf %203, %575 : vector<16x1xf32>
    %577 = arith.mulf %576, %576 : vector<16x1xf32>
    %578 = vector.extract_strided_slice %201 {offsets = [59, 0], sizes = [1, 16], strides = [1, 1]} : vector<64x16xf32> to vector<1x16xf32>
    %579 = vector.broadcast %577 : vector<16x1xf32> to vector<16x16xf32>
    %580 = vector.broadcast %578 : vector<1x16xf32> to vector<16x16xf32>
    %581 = arith.addf %579, %580 : vector<16x16xf32>
    %582 = arith.minimumf %550, %581 : vector<16x16xf32>
    %cst_89 = arith.constant 1.200000e+01 : f32
    %583 = vector.broadcast %cst_89 : f32 to vector<16x1xf32>
    %584 = arith.subf %203, %583 : vector<16x1xf32>
    %585 = arith.mulf %584, %584 : vector<16x1xf32>
    %586 = vector.extract_strided_slice %201 {offsets = [60, 0], sizes = [1, 16], strides = [1, 1]} : vector<64x16xf32> to vector<1x16xf32>
    %587 = vector.broadcast %585 : vector<16x1xf32> to vector<16x16xf32>
    %588 = vector.broadcast %586 : vector<1x16xf32> to vector<16x16xf32>
    %589 = arith.addf %587, %588 : vector<16x16xf32>
    %590 = arith.minimumf %558, %589 : vector<16x16xf32>
    %cst_90 = arith.constant 1.300000e+01 : f32
    %591 = vector.broadcast %cst_90 : f32 to vector<16x1xf32>
    %592 = arith.subf %203, %591 : vector<16x1xf32>
    %593 = arith.mulf %592, %592 : vector<16x1xf32>
    %594 = vector.extract_strided_slice %201 {offsets = [61, 0], sizes = [1, 16], strides = [1, 1]} : vector<64x16xf32> to vector<1x16xf32>
    %595 = vector.broadcast %593 : vector<16x1xf32> to vector<16x16xf32>
    %596 = vector.broadcast %594 : vector<1x16xf32> to vector<16x16xf32>
    %597 = arith.addf %595, %596 : vector<16x16xf32>
    %598 = arith.minimumf %566, %597 : vector<16x16xf32>
    %cst_91 = arith.constant 1.400000e+01 : f32
    %599 = vector.broadcast %cst_91 : f32 to vector<16x1xf32>
    %600 = arith.subf %203, %599 : vector<16x1xf32>
    %601 = arith.mulf %600, %600 : vector<16x1xf32>
    %602 = vector.extract_strided_slice %201 {offsets = [62, 0], sizes = [1, 16], strides = [1, 1]} : vector<64x16xf32> to vector<1x16xf32>
    %603 = vector.broadcast %601 : vector<16x1xf32> to vector<16x16xf32>
    %604 = vector.broadcast %602 : vector<1x16xf32> to vector<16x16xf32>
    %605 = arith.addf %603, %604 : vector<16x16xf32>
    %606 = arith.minimumf %574, %605 : vector<16x16xf32>
    %cst_92 = arith.constant 1.500000e+01 : f32
    %607 = vector.broadcast %cst_92 : f32 to vector<16x1xf32>
    %608 = arith.subf %203, %607 : vector<16x1xf32>
    %609 = arith.mulf %608, %608 : vector<16x1xf32>
    %610 = vector.extract_strided_slice %201 {offsets = [63, 0], sizes = [1, 16], strides = [1, 1]} : vector<64x16xf32> to vector<1x16xf32>
    %611 = vector.broadcast %609 : vector<16x1xf32> to vector<16x16xf32>
    %612 = vector.broadcast %610 : vector<1x16xf32> to vector<16x16xf32>
    %613 = arith.addf %611, %612 : vector<16x16xf32>
    %614 = arith.minimumf %582, %613 : vector<16x16xf32>
    %615 = arith.minimumf %590, %598 : vector<16x16xf32>
    %616 = arith.minimumf %606, %614 : vector<16x16xf32>
    %617 = arith.minimumf %615, %616 : vector<16x16xf32>
    %cst_93 = arith.constant 0.000000e+00 : f32
    %618 = vector.broadcast %cst_93 : f32 to vector<16x1xf32>
    %619 = arith.subf %203, %618 : vector<16x1xf32>
    %620 = arith.mulf %619, %619 : vector<16x1xf32>
    %621 = vector.extract_strided_slice %201 {offsets = [16, 0], sizes = [1, 16], strides = [1, 1]} : vector<64x16xf32> to vector<1x16xf32>
    %622 = vector.broadcast %620 : vector<16x1xf32> to vector<16x16xf32>
    %623 = vector.broadcast %621 : vector<1x16xf32> to vector<16x16xf32>
    %624 = arith.addf %622, %623 : vector<16x16xf32>
    %cst_94 = arith.constant 1.000000e+00 : f32
    %625 = vector.broadcast %cst_94 : f32 to vector<16x1xf32>
    %626 = arith.subf %203, %625 : vector<16x1xf32>
    %627 = arith.mulf %626, %626 : vector<16x1xf32>
    %628 = vector.extract_strided_slice %201 {offsets = [17, 0], sizes = [1, 16], strides = [1, 1]} : vector<64x16xf32> to vector<1x16xf32>
    %629 = vector.broadcast %627 : vector<16x1xf32> to vector<16x16xf32>
    %630 = vector.broadcast %628 : vector<1x16xf32> to vector<16x16xf32>
    %631 = arith.addf %629, %630 : vector<16x16xf32>
    %cst_95 = arith.constant 2.000000e+00 : f32
    %632 = vector.broadcast %cst_95 : f32 to vector<16x1xf32>
    %633 = arith.subf %203, %632 : vector<16x1xf32>
    %634 = arith.mulf %633, %633 : vector<16x1xf32>
    %635 = vector.extract_strided_slice %201 {offsets = [18, 0], sizes = [1, 16], strides = [1, 1]} : vector<64x16xf32> to vector<1x16xf32>
    %636 = vector.broadcast %634 : vector<16x1xf32> to vector<16x16xf32>
    %637 = vector.broadcast %635 : vector<1x16xf32> to vector<16x16xf32>
    %638 = arith.addf %636, %637 : vector<16x16xf32>
    %cst_96 = arith.constant 3.000000e+00 : f32
    %639 = vector.broadcast %cst_96 : f32 to vector<16x1xf32>
    %640 = arith.subf %203, %639 : vector<16x1xf32>
    %641 = arith.mulf %640, %640 : vector<16x1xf32>
    %642 = vector.extract_strided_slice %201 {offsets = [19, 0], sizes = [1, 16], strides = [1, 1]} : vector<64x16xf32> to vector<1x16xf32>
    %643 = vector.broadcast %641 : vector<16x1xf32> to vector<16x16xf32>
    %644 = vector.broadcast %642 : vector<1x16xf32> to vector<16x16xf32>
    %645 = arith.addf %643, %644 : vector<16x16xf32>
    %cst_97 = arith.constant 4.000000e+00 : f32
    %646 = vector.broadcast %cst_97 : f32 to vector<16x1xf32>
    %647 = arith.subf %203, %646 : vector<16x1xf32>
    %648 = arith.mulf %647, %647 : vector<16x1xf32>
    %649 = vector.extract_strided_slice %201 {offsets = [20, 0], sizes = [1, 16], strides = [1, 1]} : vector<64x16xf32> to vector<1x16xf32>
    %650 = vector.broadcast %648 : vector<16x1xf32> to vector<16x16xf32>
    %651 = vector.broadcast %649 : vector<1x16xf32> to vector<16x16xf32>
    %652 = arith.addf %650, %651 : vector<16x16xf32>
    %653 = arith.minimumf %624, %652 : vector<16x16xf32>
    %cst_98 = arith.constant 5.000000e+00 : f32
    %654 = vector.broadcast %cst_98 : f32 to vector<16x1xf32>
    %655 = arith.subf %203, %654 : vector<16x1xf32>
    %656 = arith.mulf %655, %655 : vector<16x1xf32>
    %657 = vector.extract_strided_slice %201 {offsets = [21, 0], sizes = [1, 16], strides = [1, 1]} : vector<64x16xf32> to vector<1x16xf32>
    %658 = vector.broadcast %656 : vector<16x1xf32> to vector<16x16xf32>
    %659 = vector.broadcast %657 : vector<1x16xf32> to vector<16x16xf32>
    %660 = arith.addf %658, %659 : vector<16x16xf32>
    %661 = arith.minimumf %631, %660 : vector<16x16xf32>
    %cst_99 = arith.constant 6.000000e+00 : f32
    %662 = vector.broadcast %cst_99 : f32 to vector<16x1xf32>
    %663 = arith.subf %203, %662 : vector<16x1xf32>
    %664 = arith.mulf %663, %663 : vector<16x1xf32>
    %665 = vector.extract_strided_slice %201 {offsets = [22, 0], sizes = [1, 16], strides = [1, 1]} : vector<64x16xf32> to vector<1x16xf32>
    %666 = vector.broadcast %664 : vector<16x1xf32> to vector<16x16xf32>
    %667 = vector.broadcast %665 : vector<1x16xf32> to vector<16x16xf32>
    %668 = arith.addf %666, %667 : vector<16x16xf32>
    %669 = arith.minimumf %638, %668 : vector<16x16xf32>
    %cst_100 = arith.constant 7.000000e+00 : f32
    %670 = vector.broadcast %cst_100 : f32 to vector<16x1xf32>
    %671 = arith.subf %203, %670 : vector<16x1xf32>
    %672 = arith.mulf %671, %671 : vector<16x1xf32>
    %673 = vector.extract_strided_slice %201 {offsets = [23, 0], sizes = [1, 16], strides = [1, 1]} : vector<64x16xf32> to vector<1x16xf32>
    %674 = vector.broadcast %672 : vector<16x1xf32> to vector<16x16xf32>
    %675 = vector.broadcast %673 : vector<1x16xf32> to vector<16x16xf32>
    %676 = arith.addf %674, %675 : vector<16x16xf32>
    %677 = arith.minimumf %645, %676 : vector<16x16xf32>
    %cst_101 = arith.constant 8.000000e+00 : f32
    %678 = vector.broadcast %cst_101 : f32 to vector<16x1xf32>
    %679 = arith.subf %203, %678 : vector<16x1xf32>
    %680 = arith.mulf %679, %679 : vector<16x1xf32>
    %681 = vector.extract_strided_slice %201 {offsets = [24, 0], sizes = [1, 16], strides = [1, 1]} : vector<64x16xf32> to vector<1x16xf32>
    %682 = vector.broadcast %680 : vector<16x1xf32> to vector<16x16xf32>
    %683 = vector.broadcast %681 : vector<1x16xf32> to vector<16x16xf32>
    %684 = arith.addf %682, %683 : vector<16x16xf32>
    %685 = arith.minimumf %653, %684 : vector<16x16xf32>
    %cst_102 = arith.constant 9.000000e+00 : f32
    %686 = vector.broadcast %cst_102 : f32 to vector<16x1xf32>
    %687 = arith.subf %203, %686 : vector<16x1xf32>
    %688 = arith.mulf %687, %687 : vector<16x1xf32>
    %689 = vector.extract_strided_slice %201 {offsets = [25, 0], sizes = [1, 16], strides = [1, 1]} : vector<64x16xf32> to vector<1x16xf32>
    %690 = vector.broadcast %688 : vector<16x1xf32> to vector<16x16xf32>
    %691 = vector.broadcast %689 : vector<1x16xf32> to vector<16x16xf32>
    %692 = arith.addf %690, %691 : vector<16x16xf32>
    %693 = arith.minimumf %661, %692 : vector<16x16xf32>
    %cst_103 = arith.constant 1.000000e+01 : f32
    %694 = vector.broadcast %cst_103 : f32 to vector<16x1xf32>
    %695 = arith.subf %203, %694 : vector<16x1xf32>
    %696 = arith.mulf %695, %695 : vector<16x1xf32>
    %697 = vector.extract_strided_slice %201 {offsets = [26, 0], sizes = [1, 16], strides = [1, 1]} : vector<64x16xf32> to vector<1x16xf32>
    %698 = vector.broadcast %696 : vector<16x1xf32> to vector<16x16xf32>
    %699 = vector.broadcast %697 : vector<1x16xf32> to vector<16x16xf32>
    %700 = arith.addf %698, %699 : vector<16x16xf32>
    %701 = arith.minimumf %669, %700 : vector<16x16xf32>
    %cst_104 = arith.constant 1.100000e+01 : f32
    %702 = vector.broadcast %cst_104 : f32 to vector<16x1xf32>
    %703 = arith.subf %203, %702 : vector<16x1xf32>
    %704 = arith.mulf %703, %703 : vector<16x1xf32>
    %705 = vector.extract_strided_slice %201 {offsets = [27, 0], sizes = [1, 16], strides = [1, 1]} : vector<64x16xf32> to vector<1x16xf32>
    %706 = vector.broadcast %704 : vector<16x1xf32> to vector<16x16xf32>
    %707 = vector.broadcast %705 : vector<1x16xf32> to vector<16x16xf32>
    %708 = arith.addf %706, %707 : vector<16x16xf32>
    %709 = arith.minimumf %677, %708 : vector<16x16xf32>
    %cst_105 = arith.constant 1.200000e+01 : f32
    %710 = vector.broadcast %cst_105 : f32 to vector<16x1xf32>
    %711 = arith.subf %203, %710 : vector<16x1xf32>
    %712 = arith.mulf %711, %711 : vector<16x1xf32>
    %713 = vector.extract_strided_slice %201 {offsets = [28, 0], sizes = [1, 16], strides = [1, 1]} : vector<64x16xf32> to vector<1x16xf32>
    %714 = vector.broadcast %712 : vector<16x1xf32> to vector<16x16xf32>
    %715 = vector.broadcast %713 : vector<1x16xf32> to vector<16x16xf32>
    %716 = arith.addf %714, %715 : vector<16x16xf32>
    %717 = arith.minimumf %685, %716 : vector<16x16xf32>
    %cst_106 = arith.constant 1.300000e+01 : f32
    %718 = vector.broadcast %cst_106 : f32 to vector<16x1xf32>
    %719 = arith.subf %203, %718 : vector<16x1xf32>
    %720 = arith.mulf %719, %719 : vector<16x1xf32>
    %721 = vector.extract_strided_slice %201 {offsets = [29, 0], sizes = [1, 16], strides = [1, 1]} : vector<64x16xf32> to vector<1x16xf32>
    %722 = vector.broadcast %720 : vector<16x1xf32> to vector<16x16xf32>
    %723 = vector.broadcast %721 : vector<1x16xf32> to vector<16x16xf32>
    %724 = arith.addf %722, %723 : vector<16x16xf32>
    %725 = arith.minimumf %693, %724 : vector<16x16xf32>
    %cst_107 = arith.constant 1.400000e+01 : f32
    %726 = vector.broadcast %cst_107 : f32 to vector<16x1xf32>
    %727 = arith.subf %203, %726 : vector<16x1xf32>
    %728 = arith.mulf %727, %727 : vector<16x1xf32>
    %729 = vector.extract_strided_slice %201 {offsets = [30, 0], sizes = [1, 16], strides = [1, 1]} : vector<64x16xf32> to vector<1x16xf32>
    %730 = vector.broadcast %728 : vector<16x1xf32> to vector<16x16xf32>
    %731 = vector.broadcast %729 : vector<1x16xf32> to vector<16x16xf32>
    %732 = arith.addf %730, %731 : vector<16x16xf32>
    %733 = arith.minimumf %701, %732 : vector<16x16xf32>
    %cst_108 = arith.constant 1.500000e+01 : f32
    %734 = vector.broadcast %cst_108 : f32 to vector<16x1xf32>
    %735 = arith.subf %203, %734 : vector<16x1xf32>
    %736 = arith.mulf %735, %735 : vector<16x1xf32>
    %737 = vector.extract_strided_slice %201 {offsets = [31, 0], sizes = [1, 16], strides = [1, 1]} : vector<64x16xf32> to vector<1x16xf32>
    %738 = vector.broadcast %736 : vector<16x1xf32> to vector<16x16xf32>
    %739 = vector.broadcast %737 : vector<1x16xf32> to vector<16x16xf32>
    %740 = arith.addf %738, %739 : vector<16x16xf32>
    %741 = arith.minimumf %709, %740 : vector<16x16xf32>
    %742 = arith.minimumf %717, %725 : vector<16x16xf32>
    %743 = arith.minimumf %733, %741 : vector<16x16xf32>
    %744 = arith.minimumf %742, %743 : vector<16x16xf32>
    %cst_109 = arith.constant 0.000000e+00 : f32
    %745 = vector.broadcast %cst_109 : f32 to vector<16x16xf32>
    %746 = arith.select %487, %617, %745 : vector<16x16xi1>, vector<16x16xf32>
    %747 = vector.shape_cast %746 : vector<16x16xf32> to vector<1x16x16xf32>
    %cst_110 = arith.constant dense<0xFF800000> : vector<1xf32>
    %748 = vector.multi_reduction <maximumf>, %747, %cst_110 [1, 2] : vector<1x16x16xf32> to vector<1xf32>
    %749 = vector.shape_cast %748 : vector<1xf32> to vector<1x1x1xf32>
    %750 = vector.extract %749[0, 0, 0] : f32 from vector<1x1x1xf32>
    %751 = math.sqrt %750 : f32
    %cst_111 = arith.constant 0.000000e+00 : f32
    %752 = vector.broadcast %cst_111 : f32 to vector<16x16xf32>
    %753 = arith.select %490, %744, %752 : vector<16x16xi1>, vector<16x16xf32>
    %754 = vector.shape_cast %753 : vector<16x16xf32> to vector<1x16x16xf32>
    %cst_112 = arith.constant dense<0xFF800000> : vector<1xf32>
    %755 = vector.multi_reduction <maximumf>, %754, %cst_112 [1, 2] : vector<1x16x16xf32> to vector<1xf32>
    %756 = vector.shape_cast %755 : vector<1xf32> to vector<1x1x1xf32>
    %757 = vector.extract %756[0, 0, 0] : f32 from vector<1x1x1xf32>
    %758 = math.sqrt %757 : f32
    %759 = arith.maximumf %751, %758 : f32
    %c1_i32_113 = arith.constant 1 : i32
    %760 = vector.broadcast %c1_i32_113 : i32 to vector<1x2xi32>
    %761 = arith.cmpi eq, %204, %760 : vector<1x2xi32>
    %762 = vector.broadcast %759 : f32 to vector<1x2xf32>
    %763 = arith.select %761, %762, %484 : vector<1x2xi1>, vector<1x2xf32>
    %764 = vector.shape_cast %763 : vector<1x2xf32> to vector<1x1x2xf32>
    %c0_114 = arith.constant 0 : index
    %c0_115 = arith.constant 0 : index
    %c0_116 = arith.constant 0 : index
    %765 = vector.load %arg3[%c0_114, %c0_115, %c0_116] : memref<1x1x2xf32, #tpu.memory_space<vmem>>, vector<1x1x2xf32>
    tpu.vector_store %arg3[%c0_114, %c0_115, %c0_116], %764 {strides = array<i32>} : memref<1x1x2xf32, #tpu.memory_space<vmem>>, vector<1x1x2xf32>,
    return
  }
  func.func @transform_0(%arg0: i32) -> (i32, i32, i32, i32) {
    %c0_i32 = arith.constant 0 : i32
    %c0_i32_0 = arith.constant 0 : i32
    %c0_i32_1 = arith.constant 0 : i32
    %c0_i32_2 = arith.constant 0 : i32
    return %arg0, %c0_i32, %c0_i32_0, %c0_i32_1 : i32, i32, i32, i32
  }
  func.func @transform_1(%arg0: i32) -> (i32, i32, i32) {
    %c0_i32 = arith.constant 0 : i32
    %c0_i32_0 = arith.constant 0 : i32
    %c0_i32_1 = arith.constant 0 : i32
    return %arg0, %c0_i32, %c0_i32_0 : i32, i32, i32
  }
  func.func @transform_2(%arg0: i32) -> (i32, i32, i32) {
    %c0_i32 = arith.constant 0 : i32
    %c0_i32_0 = arith.constant 0 : i32
    %c0_i32_1 = arith.constant 0 : i32
    return %arg0, %c0_i32, %c0_i32_0 : i32, i32, i32
  }
}

</mosaic_0001>

<bundles_post_ra>
// kernel: hausdorff_distance_loss.1
= control target key start
LH: loop header
LB: loop body
LE: loop exit
PB: predicated region body
PF: predicated region fallthrough
CT: control target
= control target key end

     0   :  { %s799_s11 = smov 32   ;;  %v800_v8 = vmov 0   ;;  %vm44_vm5 = vcmask 261120   ;;  %s801_s29 = smov 1   ;;  %v47_v25 = vlaneseq  ;;  %vm65_vm15 = vcmask 1040384   ;;  %s1419_s1 = inlined_call_operand.vmem [shape: s32[1,16,32], index: 1, kind: input, shape index: {}]   ;;  %s1420_s0 = inlined_call_operand.vmem [shape: f32[1,4,16,32], index: 0, kind: input, shape index: {}]   ;;  %s1421_s2 = inlined_call_operand.vmem [shape: f32[1,1,2], index: 2, kind: output, shape index: {}]  }
   0x1   :  { %v38_v0 = vld [vmem:[%s1419_s1] sm:$0xff]  ;;  %v39_v1 = vld [vmem:[%s1419_s1 + $0x8] sm:$0xff]  ;;  %v732_v3 = vld [vmem:[%s1420_s0 + $0x10] sm:$0xff]  ;;  %s802_s30 = smov 127  }
   0x2   :  { %40 = vrot.lane.b32.xlu0 %v38_v0, %s799_s11  ;;  %v11_v2 = vld [vmem:[%s1420_s0] sm:$0xff]  ;;  %v12_v6 = vld [vmem:[%s1420_s0 + $0x8] sm:$0xff]  ;;  %v733_v7 = vld [vmem:[%s1420_s0 + $0x18] sm:$0xff]  ;;  %v858_v26 = vand.u32 127, %v47_v25  ;;  %v110_v27 = vshrl.u32 %v47_v25, 7 }
   0x3   :  { %vm16_vm0 = vcmp.gt.f32.partialorder %v732_v3, %v11_v2  ;;  %v734_v5 = vld [vmem:[%s1420_s0 + $0x20] sm:$0xff]  ;;  %vm17_vm2 = vcmp.gt.f32.partialorder %v733_v7, %v12_v6  ;;  %v736_v11 = vld [vmem:[%s1420_s0 + $0x30] sm:$0xff]  ;;  %v735_v13 = vld [vmem:[%s1420_s0 + $0x28] sm:$0xff] }
   0x4   :  { %v20_v4 = vsel %vm16_vm0, %v732_v3, %v11_v2  ;;  %v18_v9 = vsel %vm16_vm0, 1, %v800_v8  ;;  %v21_v12 = vsel %vm17_vm2, %v733_v7, %v12_v6  ;;  %v19_v17 = vsel %vm17_vm2, 1, %v800_v8  ;;  %v737_v19 = vld [vmem:[%s1420_s0 + $0x38] sm:$0xff]  ;;  %1476 = vst [vmem:[#allocation2_spill] sm:$0xff] %v858_v26 }
   0x5   :  { %vm25_vm1 = vcmp.gt.f32.partialorder %v734_v5, %v20_v4  ;;  %vm26_vm4 = vcmp.gt.f32.partialorder %v735_v13, %v21_v12  ;;  %vm49_vm7 = vcmp.eq.s32.totalorder %v858_v26, 0  ;;  %vm51_vm8 = vcmp.eq.s32.totalorder %v858_v26, 16 }
   0x6   :  { %v29_v10 = vsel %vm25_vm1, %v734_v5, %v20_v4  ;;  %v27_v14 = vsel %vm25_vm1, 2, %v18_v9  ;;  %v30_v18 = vsel %vm26_vm4, %v735_v13, %v21_v12  ;;  %v28_v21 = vsel %vm26_vm4, 2, %v19_v17  ;;  %vm52_vm11 = vmor %vm49_vm7, %vm51_vm8 }
   0x7   :  { %vm34_vm3 = vcmp.gt.f32.partialorder %v736_v11, %v29_v10  ;;  %vm35_vm6 = vcmp.gt.f32.partialorder %v737_v19, %v30_v18  ;;  %vm50_vm9 = vcmp.eq.s32.totalorder %v858_v26, 15  ;;  %vm53_vm10 = vcmp.eq.s32.totalorder %v858_v26, 31 }
   0x8   :  { %v36_v15 = vsel %vm34_vm3, 3, %v27_v14  ;;  %v37_v22 = vsel %vm35_vm6, 3, %v28_v21  ;;  %vm55_vm12 = vcmp.eq.s32.totalorder %v858_v26, 32  ;;  %v111_v28 = vadd.s32 8, %v110_v27  ;;  %vm54_vm13 = vmor %vm50_vm9, %vm53_vm10 }
   0x9   :  { %v867_v29 = vcvt.s32.f32 %v110_v27  ;;  %vm57_vm14 = vcmp.eq.s32.totalorder %v858_v26, 47  ;;  %vm70_vm0 = vcmask 1046528   ;;  %vm56_vm1 = vmor %vm52_vm11, %vm55_vm12  ;;  %vm59_vm2 = vcmp.eq.s32.totalorder %v858_v26, 48 }
   0xa   :  { %42 = vrot.lane.b32.xlu0 %v39_v1, %s799_s11  ;;  %vm79_vm3 = vcmask 7168   ;;  %v875_v35 = vcvt.s32.f32 %v111_v28  ;;  %vm58_vm4 = vmor %vm54_vm13, %vm57_vm14  ;;  %vm86_vm8 = vcmask 515072   ;;  %vm803_vm12 = vmmov 1  }
   0xb   :  { %v752_v37 = vadd.f32 -8.0, %v867_v29  ;;  %v754_v41 = vadd.f32 -9.0, %v867_v29  ;;  %vm886_vm6 = vmor %vm56_vm1, %vm59_vm2  ;;  %v756_v44 = vadd.f32 -10.0, %v867_v29  ;;  %v758_v45 = vadd.f32 -11.0, %v867_v29 }
   0xc   :  { %v760_v46 = vadd.f32 -12.0, %v867_v29  ;;  %v762_v47 = vadd.f32 -13.0, %v867_v29  ;;  %v764_v48 = vadd.f32 -14.0, %v867_v29  ;;  %v766_v51 = vadd.f32 -15.0, %v867_v29  ;;  %vm904_vm13 = vmxor %vm886_vm6, %vm803_vm12 }
   0xd   :  { %v899_v50 = vmul.f32 %v752_v37, %v752_v37  ;;  %v911_v54 = vmul.f32 %v754_v41, %v754_v41  ;;  %v753_v55 = vadd.f32 -8.0, %v875_v35  ;;  %v919_v57 = vmul.f32 %v756_v44, %v756_v44 }
   0xe   :  { %v921_v58 = vmul.f32 %v758_v45, %v758_v45  ;;  %v755_v59 = vadd.f32 -9.0, %v875_v35  ;;  %v924_v60 = vmul.f32 %v760_v46, %v760_v46  ;;  %v926_v61 = vmul.f32 %v762_v47, %v762_v47 }
   0xf   :  { %1479 = vst [vmem:[#allocation3_spill] sm:$0xff] %v899_v50  ;;  %v928_v62 = vmul.f32 %v764_v48, %v764_v48  ;;  %v757_v63 = vadd.f32 -10.0, %v875_v35  ;;  %v759_v1 = vadd.f32 -11.0, %v875_v35  ;;  %v761_v2 = vadd.f32 -12.0, %v875_v35 }
  0x10   :  { %1482 = vst [vmem:[#allocation4_spill] sm:$0xff] %v911_v54  ;;  %v763_v3 = vadd.f32 -13.0, %v875_v35  ;;  %v765_v4 = vadd.f32 -14.0, %v875_v35  ;;  %v738_v6 = vadd.f32 -1.0, %v867_v29  ;;  %v948_v7 = vmul.f32 %v766_v51, %v766_v51 }
  0x11   :  { %1485 = vst [vmem:[#allocation5_spill] sm:$0xff] %v919_v57  ;;  %v950_v8 = vmul.f32 %v753_v55, %v753_v55  ;;  %v767_v9 = vadd.f32 -15.0, %v875_v35  ;;  %v740_v10 = vadd.f32 -2.0, %v867_v29  ;;  %v742_v11 = vadd.f32 -3.0, %v867_v29 }
  0x12   :  { %1486 = vst [vmem:[#allocation6_spill] sm:$0xff] %v921_v58  ;;  %v744_v12 = vadd.f32 -4.0, %v867_v29  ;;  %v962_v13 = vmul.f32 %v755_v59, %v755_v59  ;;  %v746_v14 = vadd.f32 -5.0, %v867_v29  ;;  %v969_v17 = vmul.f32 %v757_v63, %v757_v63 }
  0x13   :  { %1487 = vst [vmem:[#allocation7_spill] sm:$0xff] %v924_v60  ;;  %v979_v21 = vmul.f32 %v759_v1, %v759_v1  ;;  %v991_v27 = vmul.f32 %v867_v29, %v867_v29  ;;  %v993_v28 = vmul.f32 %v738_v6, %v738_v6  ;;  %v741_v42 = vadd.f32 -2.0, %v875_v35 }
  0x14   :  { %1488 = vst [vmem:[#allocation8_spill] sm:$0xff] %v926_v61  ;;  %v745_v44 = vadd.f32 -4.0, %v875_v35  ;;  %v1020_v45 = vmul.f32 %v875_v35, %v875_v35  ;;  %v747_v46 = vadd.f32 -5.0, %v875_v35  ;;  %v749_v47 = vadd.f32 -6.0, %v875_v35 }
  0x15   :  { %1489 = vst [vmem:[#allocation9_spill] sm:$0xff] %v928_v62  ;;  %v751_v48 = vadd.f32 -7.0, %v875_v35 }
  0x16   :  { %1494 = vst [vmem:[#allocation10_spill] sm:$0xff] %v948_v7  ;;  %v1045_v52 = vmul.f32 %v745_v44, %v745_v44 }
  0x17   :  { %1495 = vst [vmem:[#allocation11_spill] sm:$0xff] %v950_v8 }
  0x18   :  { %1496 = vst [vmem:[#allocation12_spill] sm:$0xff] %v962_v13 }
  0x19   :  { %1497 = vst [vmem:[#allocation13_spill] sm:$0xff] %v969_v17 }
  0x1a   :  { %1500 = vst [vmem:[#allocation14_spill] sm:$0xff] %v979_v21 }
  0x1b   :  { %1503 = vst [vmem:[#allocation17_spill] sm:$0xff] %v991_v27 }
  0x1c   :  { %1504 = vst [vmem:[#allocation18_spill] sm:$0xff] %v993_v28 }
  0x1d   :  { %1511 = vst [vmem:[#allocation25_spill] sm:$0xff] %v1020_v45 }
  0x1e   :  { %1515 = vst [vmem:[#allocation27_spill] sm:$0xff] %v1045_v52 }
  0x74   :  { %v41_v16 = vpop.permute.xlu0 %40 }
  0x75   :  { %v850_v20 = vsel %vm44_vm5, %v36_v15, %v41_v16  ;;  %v748_v15 = vadd.f32 -6.0, %v867_v29  ;;  %v750_v16 = vadd.f32 -7.0, %v867_v29 }
  0x76   :  { %75 = vrot.lane.b32.xlu1 %v850_v20, %s801_s29  ;;  %v66_v32 = vrot.slane %v850_v20, 7  ;;  %v71_v34 = vrot.slane %v850_v20, 1 }
  0x77   :  { %v1010_v29 = vmul.f32 %v748_v15, %v748_v15  ;;  %v1012_v41 = vmul.f32 %v750_v16, %v750_v16 }
  0x78   :  { %v881_v39 = vsel %vm65_vm15, %v850_v20, %v66_v32 }
  0x79   :  { %1510 = vst [vmem:[#allocation24_spill] sm:$0xff] %v1012_v41 }
  0x7c   :  { %v43_v23 = vpop.permute.xlu0 %42 }
  0x7d   :  { %v853_v24 = vsel %vm44_vm5, %v37_v22, %v43_v23  ;;  %vm61_vm5 = vcmp.eq.s32.totalorder %v858_v26, 63  ;;  %v981_v22 = vmul.f32 %v761_v2, %v761_v2  ;;  %v983_v23 = vmul.f32 %v763_v3, %v763_v3 }
  0x7e   :  { %77 = vrot.lane.b32.xlu2 %v853_v24, %s801_s29  ;;  %82 = vrot.lane.b32.xlu1 %v850_v20, %s802_s30  ;;  %v67_v31 = vrot.slane %v853_v24, 7  ;;  %v72_v33 = vrot.slane %v853_v24, 1  ;;  %vm62_vm10 = vmor %vm58_vm4, %vm61_vm5 }
  0x7f   :  { %1501 = vst [vmem:[#allocation15_spill] sm:$0xff] %v981_v22 }
  0x80   :  { %v68_v36 = vsel %vm65_vm15, %v66_v32, %v67_v31  ;;  %v74_v38 = vsel %vm70_vm0, %v72_v33, %v853_v24  ;;  %v883_v40 = vsel %vm70_vm0, %v71_v34, %v72_v33  ;;  %vm914_vm15 = vmxor %vm62_vm10, %vm803_vm12  ;;  %vm89_vm10 = vcmp.ne.s32.totalorder %v850_v20, %v881_v39  ;;  %1502 = vst [vmem:[#allocation16_spill] sm:$0xff] %v983_v23 }
  0x81   :  { %vm90_vm9 = vcmp.ne.s32.totalorder %v853_v24, %v68_v36  ;;  %vm92_vm11 = vcmp.ne.s32.totalorder %v853_v24, %v74_v38  ;;  %vm91_vm5 = vcmp.ne.s32.totalorder %v850_v20, %v883_v40  ;;  %v997_v31 = vmul.f32 %v740_v10, %v740_v10 }
  0x82   :  { %vm94_vm4 = vmor %vm90_vm9, %vm92_vm11  ;;  %v999_v32 = vmul.f32 %v742_v11, %v742_v11  ;;  %v1001_v33 = vmul.f32 %v744_v12, %v744_v12  ;;  %v739_v34 = vadd.f32 -1.0, %v875_v35  ;;  %v804_v36 = vmov 1e+18  }
  0x83   :  { %1506 = vst [vmem:[#allocation20_spill] sm:$0xff] %v997_v31  ;;  %v1008_v38 = vmul.f32 %v746_v14, %v746_v14  ;;  %vm1053_vm12 = vmor %vm89_vm10, %vm91_vm5  ;;  %v1059_v10 = vmul.f32 %v747_v46, %v747_v46  ;;  %v1061_v11 = vmul.f32 %v749_v47, %v749_v47  ;;  %v1063_v12 = vmul.f32 %v751_v48, %v751_v48 }
  0x84   :  { %1507 = vst [vmem:[#allocation21_spill] sm:$0xff] %v999_v32  ;;  %v1028_v55 = vmul.f32 %v739_v34, %v739_v34 }
  0x85   :  { %1508 = vst [vmem:[#allocation22_spill] sm:$0xff] %v1001_v33 }
  0x86   :  { %84 = vrot.lane.b32.xlu2 %v853_v24, %s802_s30  ;;  %1509 = vst [vmem:[#allocation23_spill] sm:$0xff] %v1008_v38 }
  0x87   :  { %1512 = vst [vmem:[#allocation26_spill] sm:$0xff] %v1028_v55 }
  0xd8   :  { %v78_v30 = vpop.permute.xlu2 %77 }
  0xd9   :  { %v81_v43 = vsel %vm79_vm3, %v853_v24, %v78_v30  ;;  %v995_v30 = vmul.f32 %v767_v9, %v767_v9 }
  0xda   :  { %vm96_vm14 = vcmp.ne.s32.totalorder %v853_v24, %v81_v43  ;;  %v743_v43 = vadd.f32 -3.0, %v875_v35 }
  0xdb   :  { %vm933_vm1 = vmand %vm96_vm14, %vm904_vm13  ;;  %1505 = vst [vmem:[#allocation19_spill] sm:$0xff] %v995_v30 }
  0xdc   :  { %vm100_vm6 = vmor %vm94_vm4, %vm933_vm1  ;;  %v1043_v5 = vmul.f32 %v743_v43, %v743_v43 }
  0xe0   :  { %v85_v49 = vpop.permute.xlu2 %84 }
  0xe1   :  { %v88_v53 = vsel %vm86_vm8, %v85_v49, %v853_v24 }
  0xe2   :  { %vm102_vm0 = vcmp.ne.s32.totalorder %v853_v24, %v88_v53  ;;  %v985_v24 = vmul.f32 %v765_v4, %v765_v4  ;;  %v1041_v4 = vmul.f32 %v741_v42, %v741_v42 }
  0xe3   :  { %vm943_vm2 = vmand %vm102_vm0, %vm914_vm15 }
  0xe4   :  { %vm973_vm9 = vmor %vm100_vm6, %vm943_vm2 }
  0xe5   :  { %v1006_v37 = vsel %vm973_vm9, 0.0, %v804_v36 }
  0xe6   :  { %v180_v49 = vperm.slane %v1006_v37, 0  ;;  %v189_v51 = vperm.slane %v1006_v37, 1  ;;  %v198_v53 = vperm.slane %v1006_v37, 2  ;;  %v207_v63 = vperm.slane %v1006_v37, 3 }
  0xe7   :  { %v216_v0 = vperm.slane %v1006_v37, 4  ;;  %v225_v35 = vperm.slane %v1006_v37, 5  ;;  %v1423_v1 = vperm.slane %v1006_v37, 6  ;;  %v1422_v3 = vperm.slane %v1006_v37, 7 }
  0xe8   :  { %v76_v19 = vpop.permute.xlu1 %75  ;;  %v181_v39 = vadd.f32 %v180_v49, %v899_v50  ;;  %v190_v40 = vadd.f32 %v189_v51, %v911_v54  ;;  %v199_v14 = vadd.f32 %v198_v53, %v919_v57  ;;  %v208_v15 = vadd.f32 %v207_v63, %v921_v58 }
  0xe9   :  { %v80_v25 = vsel %vm79_vm3, %v850_v20, %v76_v19  ;;  %v217_v16 = vadd.f32 %v216_v0, %v924_v60  ;;  %v226_v18 = vadd.f32 %v225_v35, %v926_v61  ;;  %v235_v19 = vadd.f32 %v1423_v1, %v928_v62 }
  0xea   :  { %vm95_vm3 = vcmp.ne.s32.totalorder %v850_v20, %v80_v25  ;;  %v182_v25 = vadd.f32 %v180_v49, %v950_v8  ;;  %v191_v56 = vadd.f32 %v189_v51, %v962_v13  ;;  %v200_v34 = vadd.f32 %v198_v53, %v969_v17 }
  0xeb   :  { %vm1032_vm11 = vmand %vm95_vm3, %vm904_vm13  ;;  %v209_v43 = vadd.f32 %v207_v63, %v979_v21  ;;  %v218_v44 = vadd.f32 %v216_v0, %v981_v22  ;;  %v227_v46 = vadd.f32 %v225_v35, %v983_v23 }
  0xec   :  { %vm99_vm13 = vmor %vm1053_vm12, %vm1032_vm11 }
  0xf0   :  { %v83_v2 = vpop.permute.xlu1 %82 }
  0xf1   :  { %v87_v9 = vsel %vm86_vm8, %v83_v2, %v850_v20 }
  0xf2   :  { %vm101_vm14 = vcmp.ne.s32.totalorder %v850_v20, %v87_v9  ;;  %v244_v20 = vadd.f32 %v1422_v3, %v948_v7 }
  0xf3   :  { %vm103_vm8 = vmand %vm101_vm14, %vm914_vm15  ;;  %vm448_vm15 = vcmask 130048  }
  0xf4   :  { %vm105_vm0 = vmor %vm99_vm13, %vm103_vm8 }
  0xf5   :  { %v107_v42 = vsel %vm105_vm0, 0.0, %v804_v36 }
  0xf6   :  { %v116_v47 = vperm.slane %v107_v42, 0  ;;  %v123_v48 = vperm.slane %v107_v42, 1  ;;  %v130_v59 = vperm.slane %v107_v42, 2  ;;  %v137_v2 = vperm.slane %v107_v42, 3 }
  0xf7   :  { %v144_v6 = vperm.slane %v107_v42, 4  ;;  %v153_v9 = vperm.slane %v107_v42, 5  ;;  %v162_v3 = vperm.slane %v107_v42, 6  ;;  %v171_v1 = vperm.slane %v107_v42, 7 }
  0xf8   :  { %v117_v49 = vadd.f32 %v116_v47, %v991_v27  ;;  %v124_v51 = vadd.f32 %v123_v48, %v993_v28  ;;  %v131_v36 = vadd.f32 %v130_v59, %v997_v31  ;;  %v138_v53 = vadd.f32 %v137_v2, %v999_v32 }
  0xf9   :  { %v145_v63 = vadd.f32 %v144_v6, %v1001_v33  ;;  %v154_v0 = vadd.f32 %v153_v9, %v1008_v38  ;;  %v163_v35 = vadd.f32 %v162_v3, %v1010_v29  ;;  %v172_v26 = vadd.f32 %v171_v1, %v1012_v41 }
  0xfa   :  { %v118_v7 = vadd.f32 %v116_v47, %v1020_v45  ;;  %v125_v42 = vadd.f32 %v123_v48, %v1028_v55  ;;  %v132_v62 = vadd.f32 %v130_v59, %v1041_v4  ;;  %v139_v23 = vadd.f32 %v137_v2, %v1043_v5 }
  0xfb   :  { %v147_v61 = vmin.f32 %v117_v49, %v145_v63  ;;  %v156_v22 = vmin.f32 %v124_v51, %v154_v0  ;;  %v165_v60 = vmin.f32 %v131_v36, %v163_v35  ;;  %v174_v21 = vmin.f32 %v138_v53, %v172_v26 }
  0xfc   :  { %v146_v58 = vadd.f32 %v144_v6, %v1045_v52  ;;  %v155_v17 = vadd.f32 %v153_v9, %v1059_v10  ;;  %v164_v57 = vadd.f32 %v162_v3, %v1061_v11  ;;  %v173_v13 = vadd.f32 %v171_v1, %v1063_v12 }
  0xfd   :  { %v183_v54 = vmin.f32 %v147_v61, %v181_v39  ;;  %v192_v47 = vmin.f32 %v156_v22, %v190_v40  ;;  %v201_v8 = vmin.f32 %v165_v60, %v199_v14  ;;  %v210_v48 = vmin.f32 %v174_v21, %v208_v15 }
  0xfe   :  { %v148_v50 = vmin.f32 %v118_v7, %v146_v58  ;;  %v157_v59 = vmin.f32 %v125_v42, %v155_v17  ;;  %v166_v41 = vmin.f32 %v132_v62, %v164_v57  ;;  %v175_v2 = vmin.f32 %v139_v23, %v173_v13 }
  0xff   :  { %v219_v49 = vmin.f32 %v183_v54, %v217_v16  ;;  %v228_v51 = vmin.f32 %v192_v47, %v226_v18  ;;  %v237_v36 = vmin.f32 %v201_v8, %v235_v19  ;;  %v246_v26 = vmin.f32 %v210_v48, %v244_v20 }
 0x100   :  { %v184_v53 = vmin.f32 %v148_v50, %v182_v25  ;;  %v193_v6 = vmin.f32 %v157_v59, %v191_v56  ;;  %v202_v63 = vmin.f32 %v166_v41, %v200_v34  ;;  %v211_v9 = vmin.f32 %v175_v2, %v209_v43  ;;  %v1521_v59 = vld [vmem:[#allocation24_spill] sm:$0xff] }
 0x101   :  { %v248_v0 = vmin.f32 %v219_v49, %v228_v51  ;;  %v250_v3 = vmin.f32 %v237_v36, %v246_v26  ;;  %v1518_v61 = vperm.slane %v1006_v37, 6  ;;  %v1519_v58 = vperm.slane %v1006_v37, 7 }
 0x102   :  { %v220_v57 = vmin.f32 %v184_v53, %v218_v44  ;;  %v229_v54 = vmin.f32 %v193_v6, %v227_v46 }
 0x103   :  { %v236_v22 = vadd.f32 %v1518_v61, %v985_v24  ;;  %v245_v60 = vadd.f32 %v1519_v58, %v995_v30  ;;  %v252_v62 = vmin.f32 %v248_v0, %v250_v3 }
 0x104   :  { %v249_v50 = vmin.f32 %v220_v57, %v229_v54 }
 0x105   :  { %v238_v7 = vmin.f32 %v202_v63, %v236_v22  ;;  %v247_v8 = vmin.f32 %v211_v9, %v245_v60  ;;  %254 = vxpose.xlu0.b32.start [1/2] (short) (narrow) %v252_v62, 64 }
 0x107   :  { %v251_v13 = vmin.f32 %v238_v7, %v247_v8  ;;  %v1523_v8 = vld [vmem:[#allocation3_spill] sm:$0xff] }
 0x109   :  { %v253_v17 = vmin.f32 %v249_v50, %v251_v13  ;;  %v1524_v13 = vld [vmem:[#allocation11_spill] sm:$0xff] }
 0x10d   :  { %255 = vxpose.xlu0.b32.end [2/2] (short) (narrow) %v253_v17, 64 }
 0x1a9   :  { %v1112_v21 = vpop.trf.xlu0 }
 0x1aa   :  { %1520 = vst [vmem:[#allocation28_spill] sm:$0xff] %v1112_v21  ;;  %v368_v23 = vperm.slane %v1112_v21, 0  ;;  %v371_v41 = vperm.slane %v1112_v21, 1  ;;  %v374_v1 = vperm.slane %v1112_v21, 2  ;;  %v377_v37 = vperm.slane %v1112_v21, 3 }
 0x1ab   :  { %v380_v39 = vperm.slane %v1112_v21, 4  ;;  %v385_v40 = vperm.slane %v1112_v21, 5  ;;  %v390_v14 = vperm.slane %v1112_v21, 6  ;;  %v395_v15 = vperm.slane %v1112_v21, 7 }
 0x1ac   :  { %v369_v16 = vadd.f32 %v368_v23, %v991_v27  ;;  %v370_v18 = vadd.f32 %v368_v23, %v1020_v45  ;;  %v372_v19 = vadd.f32 %v371_v41, %v993_v28  ;;  %v373_v20 = vadd.f32 %v371_v41, %v1028_v55  ;;  %v1525_v23 = vld [vmem:[#allocation4_spill] sm:$0xff] }
 0x1ad   :  { %v375_v25 = vadd.f32 %v374_v1, %v997_v31  ;;  %v376_v56 = vadd.f32 %v374_v1, %v1041_v4  ;;  %v378_v34 = vadd.f32 %v377_v37, %v999_v32  ;;  %v379_v43 = vadd.f32 %v377_v37, %v1043_v5  ;;  %v1526_v1 = vld [vmem:[#allocation12_spill] sm:$0xff] }
 0x1ae   :  { %v381_v44 = vadd.f32 %v380_v39, %v1001_v33  ;;  %v382_v46 = vadd.f32 %v380_v39, %v1045_v52  ;;  %v386_v35 = vadd.f32 %v385_v40, %v1008_v38  ;;  %v387_v42 = vadd.f32 %v385_v40, %v1059_v10  ;;  %v1527_v39 = vld [vmem:[#allocation5_spill] sm:$0xff] }
 0x1af   :  { %v391_v47 = vadd.f32 %v390_v14, %v1010_v29  ;;  %v392_v48 = vadd.f32 %v390_v14, %v1061_v11  ;;  %v396_v2 = vadd.f32 %v395_v15, %v1521_v59  ;;  %v397_v49 = vadd.f32 %v395_v15, %v1063_v12  ;;  %v1528_v14 = vld [vmem:[#allocation13_spill] sm:$0xff] }
 0x1b0   :  { %v383_v51 = vmin.f32 %v369_v16, %v381_v44  ;;  %v384_v36 = vmin.f32 %v370_v18, %v382_v46  ;;  %v388_v26 = vmin.f32 %v372_v19, %v386_v35  ;;  %v389_v53 = vmin.f32 %v373_v20, %v387_v42  ;;  %v1529_v16 = vld [vmem:[#allocation6_spill] sm:$0xff] }
 0x1b1   :  { %v1138_v6 = vpop.trf.xlu0  ;;  %v393_v63 = vmin.f32 %v375_v25, %v391_v47  ;;  %v394_v9 = vmin.f32 %v376_v56, %v392_v48  ;;  %v398_v0 = vmin.f32 %v378_v34, %v396_v2  ;;  %v399_v3 = vmin.f32 %v379_v43, %v397_v49  ;;  %v1530_v19 = vld [vmem:[#allocation14_spill] sm:$0xff]  ;;  %v1531_v47 = vld [vmem:[#allocation7_spill] sm:$0xff] }
 0x1b2   :  { %1522 = vst [vmem:[#allocation24_spill] sm:$0xff] %v1138_v6  ;;  %v400_v61 = vperm.slane %v1138_v6, 0  ;;  %v405_v22 = vperm.slane %v1138_v6, 1  ;;  %v410_v58 = vperm.slane %v1138_v6, 2  ;;  %v415_v60 = vperm.slane %v1138_v6, 3  ;;  %v1532_v2 = vld [vmem:[#allocation15_spill] sm:$0xff] }
 0x1b3   :  { %v420_v57 = vperm.slane %v1138_v6, 4  ;;  %v425_v62 = vperm.slane %v1138_v6, 5  ;;  %v430_v54 = vperm.slane %v1138_v6, 6  ;;  %v435_v7 = vperm.slane %v1138_v6, 7  ;;  %v1534_v6 = vld [vmem:[#allocation16_spill] sm:$0xff] }
 0x1b4   :  { %v401_v50 = vadd.f32 %v400_v61, %v1523_v8  ;;  %v402_v17 = vadd.f32 %v400_v61, %v1524_v13  ;;  %v406_v41 = vadd.f32 %v405_v22, %v1525_v23  ;;  %v407_v37 = vadd.f32 %v405_v22, %v1526_v1  ;;  %v1533_v61 = vld [vmem:[#allocation8_spill] sm:$0xff] }
 0x1b5   :  { %v411_v40 = vadd.f32 %v410_v58, %v1527_v39  ;;  %v412_v15 = vadd.f32 %v410_v58, %v1528_v14  ;;  %v416_v18 = vadd.f32 %v415_v60, %v1529_v16  ;;  %v417_v20 = vadd.f32 %v415_v60, %v1530_v19  ;;  %v1536_v16 = vld [vmem:[#allocation9_spill] sm:$0xff] }
 0x1b6   :  { %v403_v25 = vmin.f32 %v383_v51, %v401_v50  ;;  %v404_v56 = vmin.f32 %v384_v36, %v402_v17  ;;  %v408_v34 = vmin.f32 %v388_v26, %v406_v41  ;;  %v409_v43 = vmin.f32 %v389_v53, %v407_v37  ;;  %v1537_v36 = vld [vmem:[#allocation10_spill] sm:$0xff] }
 0x1b7   :  { %v413_v44 = vmin.f32 %v393_v63, %v411_v40  ;;  %v414_v46 = vmin.f32 %v394_v9, %v412_v15  ;;  %v418_v35 = vmin.f32 %v398_v0, %v416_v18  ;;  %v419_v42 = vmin.f32 %v399_v3, %v417_v20 }
 0x1b8   :  { %v421_v48 = vadd.f32 %v420_v57, %v1531_v47  ;;  %v422_v49 = vadd.f32 %v420_v57, %v1532_v2  ;;  %v426_v22 = vadd.f32 %v425_v62, %v1533_v61  ;;  %v427_v58 = vadd.f32 %v425_v62, %v1534_v6 }
 0x1b9   :  { %v1160_v21 = vpop.trf.xlu0  ;;  %v431_v60 = vadd.f32 %v430_v54, %v1536_v16  ;;  %v432_v51 = vadd.f32 %v430_v54, %v985_v24  ;;  %v436_v26 = vadd.f32 %v435_v7, %v1537_v36  ;;  %v437_v53 = vadd.f32 %v435_v7, %v995_v30 }
 0x1ba   :  { %1535 = vst [vmem:[#allocation3_spill] sm:$0xff] %v1160_v21  ;;  %v423_v63 = vmin.f32 %v403_v25, %v421_v48  ;;  %v424_v9 = vmin.f32 %v404_v56, %v422_v49  ;;  %v428_v0 = vmin.f32 %v408_v34, %v426_v22  ;;  %v429_v3 = vmin.f32 %v409_v43, %v427_v58 }
 0x1bb   :  { %v433_v50 = vmin.f32 %v413_v44, %v431_v60  ;;  %v434_v57 = vmin.f32 %v414_v46, %v432_v51  ;;  %v438_v17 = vmin.f32 %v418_v35, %v436_v26  ;;  %v439_v41 = vmin.f32 %v419_v42, %v437_v53 }
 0x1bc   :  { %v440_v37 = vmin.f32 %v423_v63, %v428_v0  ;;  %v1166_v62 = vmin.f32 %v424_v9, %v429_v3  ;;  %v588_v54 = vperm.slane %v1160_v21, 0  ;;  %v591_v18 = vperm.slane %v1160_v21, 1 }
 0x1bd   :  { %v442_v40 = vmin.f32 %v433_v50, %v438_v17  ;;  %v1168_v15 = vmin.f32 %v434_v57, %v439_v41  ;;  %v594_v7 = vperm.slane %v1160_v21, 2  ;;  %v600_v20 = vperm.slane %v1160_v21, 4 }
 0x1be   :  { %v597_v34 = vperm.slane %v1160_v21, 3  ;;  %v589_v43 = vadd.f32 %v588_v54, %v991_v27  ;;  %v590_v44 = vadd.f32 %v588_v54, %v1020_v45  ;;  %v1180_v46 = vadd.f32 %v591_v18, %v993_v28 }
 0x1bf   :  { %v444_v25 = vmin.f32 %v440_v37, %v442_v40  ;;  %v1183_v35 = vadd.f32 %v591_v18, %v1028_v55  ;;  %v1188_v48 = vadd.f32 %v594_v7, %v997_v31  ;;  %v1191_v49 = vadd.f32 %v594_v7, %v1041_v4 }
 0x1c0   :  { %v601_v22 = vadd.f32 %v600_v20, %v1001_v33  ;;  %v602_v58 = vadd.f32 %v600_v20, %v1045_v52  ;;  %v605_v60 = vperm.slane %v1160_v21, 5  ;;  %v610_v51 = vperm.slane %v1160_v21, 6 }
 0x1c1   :  { %v1185_v42 = vpop.trf.xlu0  ;;  %v615_v26 = vperm.slane %v1160_v21, 7  ;;  %v1200_v63 = vadd.f32 %v597_v34, %v999_v32  ;;  %v1203_v9 = vadd.f32 %v597_v34, %v1043_v5 }
 0x1c2   :  { %v620_v53 = vperm.slane %v1185_v42, 0  ;;  %v625_v0 = vperm.slane %v1185_v42, 1  ;;  %v630_v3 = vperm.slane %v1185_v42, 2  ;;  %v606_v50 = vadd.f32 %v605_v60, %v1008_v38 }
 0x1c3   :  { %1538 = vst [vmem:[#allocation11_spill] sm:$0xff] %v1203_v9  ;;  %v607_v57 = vadd.f32 %v605_v60, %v1059_v10  ;;  %v1210_v17 = vadd.f32 %v610_v51, %v1010_v29  ;;  %v1213_v41 = vadd.f32 %v610_v51, %v1061_v11  ;;  %v1216_v37 = vadd.f32 %v615_v26, %v1521_v59 }
 0x1c4   :  { %v1219_v40 = vadd.f32 %v615_v26, %v1063_v12  ;;  %v621_v54 = vadd.f32 %v620_v53, %v1523_v8  ;;  %v622_v18 = vadd.f32 %v620_v53, %v1524_v13  ;;  %v603_v7 = vmin.f32 %v589_v43, %v601_v22 }
 0x1c5   :  { %v604_v20 = vmin.f32 %v590_v44, %v602_v58  ;;  %v608_v34 = vmin.f32 %v1180_v46, %v606_v50  ;;  %v609_v60 = vmin.f32 %v1183_v35, %v607_v57  ;;  %v626_v44 = vadd.f32 %v625_v0, %v1525_v23 }
 0x1c6   :  { %1539 = vst [vmem:[#allocation4_spill] sm:$0xff] %v1219_v40  ;;  %v1233_v30 = vmin.f32 %v603_v7, %v621_v54  ;;  %v627_v46 = vadd.f32 %v625_v0, %v1526_v1  ;;  %v1240_v22 = vadd.f32 %v630_v3, %v1527_v39  ;;  %v1243_v58 = vadd.f32 %v630_v3, %v1528_v14 }
 0x1c7   :  { %v1235_v43 = vmin.f32 %v604_v20, %v622_v18  ;;  %vm507_vm3 = vcmp.lt.f32.partialorder %v1185_v42, 0.5 }
 0x1c8   :  { %1540 = vst [vmem:[#allocation12_spill] sm:$0xff] %v1233_v30 }
 0x1c9   :  { %1541 = vst [vmem:[#allocation14_spill] sm:$0xff] %v1235_v43  ;;  %v274_v35 = vpop.trf.xlu0 }
 0x1ca   :  { %vm288_vm1 = vcmp.lt.f32.partialorder %v274_v35, 0.5  ;;  %v290_v57 = vperm.slane %v274_v35, 0  ;;  %v293_v54 = vperm.slane %v274_v35, 1  ;;  %v296_v18 = vperm.slane %v274_v35, 2 }
 0x1cb   :  { %v475_v7 = vsel %vm288_vm1, %v444_v25, 0.0  ;;  %v299_v20 = vperm.slane %v274_v35, 3  ;;  %v302_v21 = vperm.slane %v274_v35, 4  ;;  %v307_v26 = vperm.slane %v274_v35, 5 }
 0x1cc   :  { %v291_v0 = vadd.f32 %v290_v57, %v991_v27  ;;  %v292_v56 = vadd.f32 %v290_v57, %v1020_v45  ;;  %v477_v53 = vsel %vm448_vm15, %v475_v7, -inf  ;;  %v294_v50 = vadd.f32 %v293_v54, %v993_v28 }
 0x1cd   :  { %v295_v43 = vadd.f32 %v293_v54, %v1028_v55  ;;  %v297_v30 = vadd.f32 %v296_v18, %v997_v31  ;;  %v298_v25 = vadd.f32 %v296_v18, %v1041_v4  ;;  %v303_v40 = vadd.f32 %v302_v21, %v1001_v33 }
 0x1ce   :  { %v304_v27 = vadd.f32 %v302_v21, %v1045_v52  ;;  %v308_v57 = vadd.f32 %v307_v26, %v1008_v38  ;;  %v300_v51 = vadd.f32 %v299_v20, %v999_v32  ;;  %v309_v3 = vadd.f32 %v307_v26, %v1059_v10 }
 0x1cf   :  { %v312_v45 = vperm.slane %v274_v35, 6  ;;  %v317_v7 = vperm.slane %v274_v35, 7  ;;  %v301_v28 = vadd.f32 %v299_v20, %v1043_v5  ;;  %v305_v9 = vmin.f32 %v291_v0, %v303_v40 }
 0x1d0   :  { %v306_v54 = vmin.f32 %v292_v56, %v304_v27  ;;  %v1262_v55 = vmin.f32 %v608_v34, %v626_v44  ;;  %v310_v18 = vmin.f32 %v294_v50, %v308_v57  ;;  %v1266_v52 = vmin.f32 %v609_v60, %v627_v46 }
 0x1d1   :  { %v275_v31 = vpop.trf.xlu0  ;;  %v313_v33 = vadd.f32 %v312_v45, %v1010_v29  ;;  %v314_v21 = vadd.f32 %v312_v45, %v1061_v11  ;;  %v311_v38 = vmin.f32 %v295_v43, %v309_v3  ;;  %v1542_v35 = vmin.f32 %v1166_v62, %v1168_v15 }
 0x1d2   :  { %vm289_vm2 = vcmp.lt.f32.partialorder %v275_v31, 0.5  ;;  %v322_v32 = vperm.slane %v275_v31, 0  ;;  %v327_v26 = vperm.slane %v275_v31, 1  ;;  %v318_v27 = vadd.f32 %v317_v7, %v1521_v59 }
 0x1d3   :  { %v476_v20 = vsel %vm289_vm2, %v1542_v35, 0.0  ;;  %v315_v40 = vmin.f32 %v297_v30, %v313_v33  ;;  %v319_v56 = vadd.f32 %v317_v7, %v1063_v12  ;;  %v316_v44 = vmin.f32 %v298_v25, %v314_v21  ;;  %v1543_v21 = vld [vmem:[#allocation6_spill] sm:$0xff] }
 0x1d4   :  { %v478_v34 = vsel %vm448_vm15, %v476_v20, -inf  ;;  %v323_v45 = vadd.f32 %v322_v32, %v1523_v8  ;;  %v324_v60 = vadd.f32 %v322_v32, %v1524_v13  ;;  %v328_v43 = vadd.f32 %v327_v26, %v1525_v23 }
 0x1d5   :  { %v479_v46 = vmax.f32 %v477_v53, %v478_v34  ;;  %v329_v50 = vadd.f32 %v327_v26, %v1526_v1  ;;  %v332_v0 = vperm.slane %v275_v31, 2  ;;  %v337_v30 = vperm.slane %v275_v31, 3 }
 0x1d6   :  { %v325_v62 = vmin.f32 %v305_v9, %v323_v45  ;;  %v326_v15 = vmin.f32 %v306_v54, %v324_v60  ;;  %v342_v33 = vperm.slane %v275_v31, 4  ;;  %v330_v3 = vmin.f32 %v310_v18, %v328_v43 }
 0x1d7   :  { %480 = vmax.xlane.f32.xlu2 %v479_v46  ;;  %v331_v57 = vmin.f32 %v311_v38, %v329_v50  ;;  %v333_v7 = vadd.f32 %v332_v0, %v1527_v39  ;;  %v334_v25 = vadd.f32 %v332_v0, %v1528_v14  ;;  %v338_v35 = vadd.f32 %v337_v30, %v1543_v21 }
 0x1d8   :  { %v339_v32 = vadd.f32 %v337_v30, %v1530_v19  ;;  %v343_v53 = vadd.f32 %v342_v33, %v1531_v47  ;;  %v344_v26 = vadd.f32 %v342_v33, %v1532_v2  ;;  %v347_v34 = vperm.slane %v275_v31, 5 }
 0x1d9   :  { %v1284_v20 = vpop.trf.xlu0  ;;  %v335_v9 = vmin.f32 %v315_v40, %v333_v7  ;;  %v336_v54 = vmin.f32 %v316_v44, %v334_v25  ;;  %v352_v45 = vperm.slane %v275_v31, 6  ;;  %v320_v18 = vmin.f32 %v300_v51, %v318_v27  ;;  %v1545_v51 = vld [vmem:[#allocation28_spill] sm:$0xff]  ;;  %v1547_v25 = vld [vmem:[#allocation19_spill] sm:$0xff] }
 0x1da   :  { %v321_v38 = vmin.f32 %v301_v28, %v319_v56  ;;  %v345_v60 = vmin.f32 %v325_v62, %v343_v53  ;;  %v346_v46 = vmin.f32 %v326_v15, %v344_v26  ;;  %v348_v43 = vadd.f32 %v347_v34, %v1533_v61  ;;  %v1546_v28 = vld [vmem:[#allocation24_spill] sm:$0xff] }
 0x1db   :  { %v349_v50 = vadd.f32 %v347_v34, %v1534_v6  ;;  %v353_v0 = vadd.f32 %v352_v45, %v1536_v16  ;;  %v354_v30 = vadd.f32 %v352_v45, %v985_v24  ;;  %v340_v14 = vmin.f32 %v320_v18, %v338_v35 }
 0x1dc   :  { %v341_v33 = vmin.f32 %v321_v38, %v339_v32  ;;  %v357_v39 = vperm.slane %v275_v31, 7  ;;  %v1544_v40 = vmin.f32 %v1188_v48, %v1210_v17  ;;  %vm286_vm4 = vcmp.lt.f32.partialorder %v1545_v51, 0.5 }
 0x1dd   :  { %vm287_vm5 = vcmp.lt.f32.partialorder %v1546_v28, 0.5  ;;  %v350_v27 = vmin.f32 %v330_v3, %v348_v43  ;;  %v351_v56 = vmin.f32 %v331_v57, %v349_v50  ;;  %v355_v62 = vmin.f32 %v335_v9, %v353_v0  ;;  %v1555_v43 = vld [vmem:[#allocation4_spill] sm:$0xff] }
 0x1de   :  { %v633_v44 = vmin.f32 %v1544_v40, %v1240_v22  ;;  %v356_v15 = vmin.f32 %v336_v54, %v354_v30  ;;  %v358_v7 = vadd.f32 %v357_v39, %v1537_v36  ;;  %v359_v53 = vadd.f32 %v357_v39, %v1547_v25  ;;  %v1560_v40 = vld [vmem:[#allocation14_spill] sm:$0xff] }
 0x1df   :  { %v1548_v31 = vperm.slane %v1185_v42, 3  ;;  %v362_v22 = vmin.f32 %v345_v60, %v350_v27  ;;  %v363_v32 = vmin.f32 %v346_v46, %v351_v56  ;;  %v1550_v3 = vmin.f32 %v1191_v49, %v1213_v41  ;;  %v1554_v46 = vld [vmem:[#allocation11_spill] sm:$0xff] }
 0x1e0   :  { %v1551_v26 = vperm.slane %v1185_v42, 4  ;;  %v360_v39 = vmin.f32 %v340_v14, %v358_v7  ;;  %v361_v54 = vmin.f32 %v341_v33, %v359_v53  ;;  %v1552_v34 = vmin.f32 %v1200_v63, %v1216_v37 }
 0x1e1   :  { %v636_v35 = vadd.f32 %v1548_v31, %v1543_v21  ;;  %v1549_v48 = vmov %v1548_v31  ;;  %v634_v57 = vmin.f32 %v1550_v3, %v1243_v58  ;;  %v1317_v60 = vpop.trf.xlu0  ;;  %v1556_v49 = vmin.f32 %v1554_v46, %v1555_v43  ;;  %v1557_v58 = vld [vmem:[#allocation12_spill] sm:$0xff] }
 0x1e2   :  { %v637_v17 = vadd.f32 %v1549_v48, %v1530_v19  ;;  %v641_v9 = vadd.f32 %v1551_v26, %v1531_v47  ;;  %v1553_v18 = vmov %v1551_v26  ;;  %v1558_v14 = vperm.slane %v1185_v42, 5 }
 0x1e3   :  { %v638_v45 = vmin.f32 %v1552_v34, %v636_v35  ;;  %v642_v38 = vadd.f32 %v1553_v18, %v1532_v2  ;;  %v364_v30 = vmin.f32 %v355_v62, %v360_v39  ;;  %v365_v33 = vmin.f32 %v356_v15, %v361_v54 }
 0x1e4   :  { %v639_v41 = vmin.f32 %v1556_v49, %v637_v17  ;;  %v643_v50 = vmin.f32 %v1557_v58, %v641_v9  ;;  %v646_v0 = vadd.f32 %v1558_v14, %v1533_v61  ;;  %v1559_v63 = vmov %v1558_v14 }
 0x1e5   :  { %v647_v37 = vadd.f32 %v1559_v63, %v1534_v6  ;;  %v644_v27 = vmin.f32 %v1560_v40, %v642_v38  ;;  %v1561_v56 = vperm.slane %v1185_v42, 6  ;;  %v655_v17 = vperm.slane %v1185_v42, 7 }
 0x1e6   :  { %v648_v53 = vmin.f32 %v1262_v55, %v646_v0  ;;  %v366_v3 = vmin.f32 %v362_v22, %v364_v30  ;;  %v367_v26 = vmin.f32 %v363_v32, %v365_v33  ;;  %vm508_vm6 = vcmp.lt.f32.partialorder %v1284_v20, 0.5  ;;  %v1564_v0 = vld [vmem:[#allocation25_spill] sm:$0xff] }
 0x1e7   :  { %v651_v7 = vadd.f32 %v1561_v56, %v1536_v16  ;;  %v649_v31 = vmin.f32 %v1266_v52, %v647_v37  ;;  %v1562_v35 = vmov %v1561_v56  ;;  %vm509_vm9 = vcmp.lt.f32.partialorder %v1317_v60, 0.5  ;;  %v1566_v37 = vld [vmem:[#allocation26_spill] sm:$0xff] }
 0x1e8   :  { %v652_v48 = vadd.f32 %v1562_v35, %v985_v24  ;;  %v656_v9 = vadd.f32 %v655_v17, %v1537_v36  ;;  %v657_v55 = vadd.f32 %v655_v17, %v1547_v25  ;;  %v446_v52 = vsel %vm286_vm4, %v366_v3, 0.0  ;;  %v1570_v3 = vld [vmem:[#allocation27_spill] sm:$0xff] }
 0x1e9   :  { %v653_v62 = vmin.f32 %v633_v44, %v651_v7  ;;  %v447_v39 = vsel %vm287_vm5, %v367_v26, 0.0  ;;  %v660_v54 = vmin.f32 %v643_v50, %v648_v53  ;;  %v661_v34 = vmin.f32 %v644_v27, %v649_v31  ;;  %v1563_v50 = vld [vmem:[#allocation17_spill] sm:$0xff]  ;;  %v1567_v27 = vld [vmem:[#allocation20_spill] sm:$0xff] }
 0x1ea   :  { %v654_v15 = vmin.f32 %v634_v57, %v652_v48  ;;  %v449_v22 = vsel %vm448_vm15, %v446_v52, -inf  ;;  %v450_v32 = vsel %vm448_vm15, %v447_v39, -inf  ;;  %v658_v18 = vmin.f32 %v638_v45, %v656_v9  ;;  %v1565_v45 = vld [vmem:[#allocation18_spill] sm:$0xff]  ;;  %v1568_v53 = vld [vmem:[#allocation21_spill] sm:$0xff] }
 0x1eb   :  { %v659_v38 = vmin.f32 %v639_v41, %v657_v55  ;;  %v451_v44 = vmax.f32 %v449_v22, %v450_v32  ;;  %v510_v57 = vperm.slane %v1284_v20, 0  ;;  %v513_v46 = vperm.slane %v1284_v20, 1  ;;  %v1569_v48 = vld [vmem:[#allocation22_spill] sm:$0xff] }
 0x1ec   :  { %v516_v43 = vperm.slane %v1284_v20, 2  ;;  %v662_v51 = vmin.f32 %v653_v62, %v658_v18  ;;  %v519_v28 = vperm.slane %v1284_v20, 3  ;;  %v522_v58 = vperm.slane %v1284_v20, 4 }
 0x1ed   :  { %v663_v49 = vmin.f32 %v654_v15, %v659_v38  ;;  %452 = vmax.xlane.f32.xlu1 %v451_v44  ;;  %v511_v14 = vadd.f32 %v510_v57, %v1563_v50  ;;  %v512_v63 = vadd.f32 %v510_v57, %v1564_v0  ;;  %v514_v41 = vadd.f32 %v513_v46, %v1565_v45  ;;  %v1572_v0 = vld [vmem:[#allocation5_spill] sm:$0xff] }
 0x1ee   :  { %v515_v30 = vadd.f32 %v513_v46, %v1566_v37  ;;  %v664_v33 = vmin.f32 %v660_v54, %v662_v51  ;;  %v517_v56 = vadd.f32 %v516_v43, %v1567_v27  ;;  %v518_v7 = vadd.f32 %v516_v43, %v1041_v4 }
 0x1ef   :  { %v665_v40 = vmin.f32 %v661_v34, %v663_v49  ;;  %v520_v31 = vadd.f32 %v519_v28, %v1568_v53  ;;  %v521_v35 = vadd.f32 %v519_v28, %v1043_v5  ;;  %v523_v17 = vadd.f32 %v522_v58, %v1569_v48  ;;  %v1571_v34 = vld [vmem:[#allocation23_spill] sm:$0xff] }
 0x1f0   :  { %v524_v26 = vadd.f32 %v522_v58, %v1570_v3  ;;  %v694_v62 = vsel %vm508_vm6, %v664_v33, 0.0  ;;  %v527_v9 = vperm.slane %v1284_v20, 5  ;;  %v532_v55 = vperm.slane %v1284_v20, 6 }
 0x1f1   :  { %v695_v15 = vsel %vm509_vm9, %v665_v40, 0.0  ;;  %v696_v4 = vsel %vm448_vm15, %v694_v62, -inf  ;;  %v525_v39 = vmin.f32 %v511_v14, %v523_v17  ;;  %v537_v44 = vperm.slane %v1284_v20, 7 }
 0x1f2   :  { %v697_v52 = vsel %vm448_vm15, %v695_v15, -inf  ;;  %v526_v5 = vmin.f32 %v512_v63, %v524_v26  ;;  %v528_v22 = vadd.f32 %v527_v9, %v1571_v34  ;;  %v529_v32 = vadd.f32 %v527_v9, %v1059_v10 }
 0x1f3   :  { %v698_v54 = vmax.f32 %v696_v4, %v697_v52  ;;  %v533_v18 = vadd.f32 %v532_v55, %v1010_v29  ;;  %v534_v38 = vadd.f32 %v532_v55, %v1061_v11  ;;  %v542_v57 = vperm.slane %v1317_v60, 0 }
 0x1f4   :  { %v547_v46 = vperm.slane %v1317_v60, 1  ;;  %v530_v43 = vmin.f32 %v514_v41, %v528_v22  ;;  %v531_v51 = vmin.f32 %v515_v30, %v529_v32  ;;  %v552_v28 = vperm.slane %v1317_v60, 2  ;;  %v1573_v41 = vld [vmem:[#allocation13_spill] sm:$0xff]  ;;  %v1574_v22 = vld [vmem:[#allocation3_spill] sm:$0xff] }
 0x1f5   :  { %699 = vmax.xlane.f32.xlu0 %v698_v54  ;;  %v535_v49 = vmin.f32 %v517_v56, %v533_v18  ;;  %v536_v58 = vmin.f32 %v518_v7, %v534_v38  ;;  %v538_v50 = vadd.f32 %v537_v44, %v1521_v59  ;;  %v539_v10 = vadd.f32 %v537_v44, %v1063_v12 }
 0x1f6   :  { %v543_v29 = vadd.f32 %v542_v57, %v1523_v8  ;;  %v544_v11 = vadd.f32 %v542_v57, %v1524_v13  ;;  %v548_v20 = vadd.f32 %v547_v46, %v1525_v23  ;;  %v549_v14 = vadd.f32 %v547_v46, %v1526_v1 }
 0x1f7   :  { %v553_v63 = vadd.f32 %v552_v28, %v1572_v0  ;;  %v540_v45 = vmin.f32 %v520_v31, %v538_v50  ;;  %v554_v37 = vadd.f32 %v552_v28, %v1573_v41  ;;  %v541_v30 = vmin.f32 %v521_v35, %v539_v10 }
 0x1f8   :  { %v545_v33 = vmin.f32 %v525_v39, %v543_v29  ;;  %v546_v40 = vmin.f32 %v526_v5, %v544_v11  ;;  %v550_v27 = vmin.f32 %v530_v43, %v548_v20  ;;  %v551_v59 = vmin.f32 %v531_v51, %v549_v14 }
 0x1f9   :  { %v557_v12 = vperm.slane %v1317_v60, 3  ;;  %v562_v8 = vperm.slane %v1317_v60, 4  ;;  %v567_v13 = vperm.slane %v1317_v60, 5  ;;  %v555_v56 = vmin.f32 %v535_v49, %v553_v63 }
 0x1fa   :  { %v556_v23 = vmin.f32 %v536_v58, %v554_v37  ;;  %v572_v1 = vperm.slane %v1317_v60, 6  ;;  %v577_v7 = vperm.slane %v1317_v60, 7  ;;  %vm506_vm10 = vcmp.lt.f32.partialorder %v1574_v22, 0.5 }
 0x1fb   :  { %v558_v53 = vadd.f32 %v557_v12, %v1543_v21  ;;  %v559_v31 = vadd.f32 %v557_v12, %v1530_v19  ;;  %v563_v35 = vadd.f32 %v562_v8, %v1531_v47  ;;  %v564_v48 = vadd.f32 %v562_v8, %v1532_v2 }
 0x1fc   :  { %v568_v17 = vadd.f32 %v567_v13, %v1533_v61  ;;  %v569_v3 = vadd.f32 %v567_v13, %v1534_v6  ;;  %v573_v26 = vadd.f32 %v572_v1, %v1536_v16  ;;  %v574_v62 = vadd.f32 %v572_v1, %v985_v24 }
 0x1fd   :  { %v560_v15 = vmin.f32 %v540_v45, %v558_v53  ;;  %v561_v9 = vmin.f32 %v541_v30, %v559_v31  ;;  %v565_v55 = vmin.f32 %v545_v33, %v563_v35  ;;  %v566_v60 = vmin.f32 %v546_v40, %v564_v48 }
 0x1fe   :  { %v570_v4 = vmin.f32 %v550_v27, %v568_v17  ;;  %v571_v21 = vmin.f32 %v551_v59, %v569_v3  ;;  %v575_v52 = vmin.f32 %v555_v56, %v573_v26  ;;  %v576_v19 = vmin.f32 %v556_v23, %v574_v62 }
 0x1ff   :  { %v578_v47 = vadd.f32 %v577_v7, %v1537_v36  ;;  %v579_v2 = vadd.f32 %v577_v7, %v1547_v25  ;;  %vm726_vm4 = vcmask 8192  }
 0x200   :  { %v582_v5 = vmin.f32 %v565_v55, %v570_v4  ;;  %v583_v6 = vmin.f32 %v566_v60, %v571_v21 }
 0x201   :  { %v580_v39 = vmin.f32 %v560_v15, %v578_v47  ;;  %v581_v61 = vmin.f32 %v561_v9, %v579_v2 }
 0x203   :  { %v584_v54 = vmin.f32 %v575_v52, %v580_v39  ;;  %v585_v16 = vmin.f32 %v576_v19, %v581_v61 }
 0x205   :  { %v586_v34 = vmin.f32 %v582_v5, %v584_v54  ;;  %v587_v24 = vmin.f32 %v583_v6, %v585_v16 }
 0x207   :  { %v666_v32 = vsel %vm506_vm10, %v586_v34, 0.0  ;;  %v667_v18 = vsel %vm507_vm3, %v587_v24, 0.0 }
 0x208   :  { %v668_v38 = vsel %vm448_vm15, %v666_v32, -inf  ;;  %v669_v36 = vsel %vm448_vm15, %v667_v18, -inf }
 0x209   :  { %v670_v44 = vmax.f32 %v668_v38, %v669_v36 }
 0x20b   :  { %671 = vmax.xlane.f32.xlu2 %v670_v44 }
 0x24a   :  { %v481_v58 = vpop.xlane.xlu2 %480 }
 0x24b   :  { %v482_v42 = vrot.slane %v481_v58, 4 }
 0x24d   :  { %v483_v10 = vmax.f32 %v481_v58, %v482_v42  ;;  %v1575_v42 = vld [vmem:[#allocation2_spill] sm:$0xff] }
 0x24e   :  { %vm723_vm2 = vcmp.eq.s32.totalorder %v1575_v42, 1 }
 0x24f   :  { %v484_v20 = vrot.slane %v483_v10, 2 }
 0x251   :  { %v485_v63 = vmax.f32 %v483_v10, %v484_v20 }
 0x253   :  { %v486_v37 = vrot.slane %v485_v63, 1 }
 0x255   :  { %v487_v59 = vmax.f32 %v485_v63, %v486_v37 }
 0x260   :  { %v453_v25 = vpop.xlane.xlu1 %452 }
 0x261   :  { %v454_v57 = vrot.slane %v453_v25, 4 }
 0x263   :  { %v455_v46 = vmax.f32 %v453_v25, %v454_v57 }
 0x265   :  { %v456_v43 = vrot.slane %v455_v46, 2 }
 0x267   :  { %v457_v51 = vmax.f32 %v455_v46, %v456_v43 }
 0x268   :  { %v700_v60 = vpop.xlane.xlu0 %699 }
 0x269   :  { %v458_v49 = vrot.slane %v457_v51, 1  ;;  %v701_v21 = vrot.slane %v700_v60, 4 }
 0x26b   :  { %v459_v28 = vmax.f32 %v457_v51, %v458_v49  ;;  %v702_v52 = vmax.f32 %v700_v60, %v701_v21 }
 0x26d   :  { %768 = vpush %v459_v28  ;;  %v703_v2 = vrot.slane %v702_v52, 2 }
 0x26f   :  { %v704_v5 = vmax.f32 %v702_v52, %v703_v2 }
 0x271   :  { %v705_v16 = vrot.slane %v704_v5, 1 }
 0x273   :  { %v706_v18 = vmax.f32 %v704_v5, %v705_v16 }
 0x27e   :  { %v672_v12 = vpop.xlane.xlu2 %671 }
 0x27f   :  { %v673_v13 = vrot.slane %v672_v12, 4 }
 0x281   :  { %v674_v56 = vmax.f32 %v672_v12, %v673_v13 }
 0x283   :  { %v675_v7 = vrot.slane %v674_v56, 2 }
 0x285   :  { %v676_v35 = vmax.f32 %v674_v56, %v675_v7 }
 0x287   :  { %v677_v3 = vrot.slane %v676_v35, 1 }
 0x289   :  { %v678_v55 = vmax.f32 %v676_v35, %v677_v3 }
 0x29e   :  { %s769_s0 = spop %768 }
 0x29f   :  { %v461_v50 = vstv %s769_s0 }
 0x2a0   :  { %791 = vrsqrt.f32 %v461_v50  ;;  %vm469_vm11 = vcmp.eq.f32.partialorder %v461_v50, inf  ;;  %v472_v33 = vand.u32 2147483648, %v461_v50  ;;  %vm471_vm12 = vcmp.eq.f32.partialorder %v461_v50, 0.0 }
 0x2a6   :  { %v792_v29 = vpop.eup %791 }
 0x2a7   :  { %v463_v11 = vmul.f32 %v792_v29, %v461_v50 }
 0x2a9   :  { %v464_v14 = vmul.f32 %v792_v29, %v463_v11 }
 0x2ab   :  { %v465_v0 = vmul.f32 0.5, %v464_v14 }
 0x2ad   :  { %v466_v45 = vsub.f32 1.5, %v465_v0 }
 0x2af   :  { %v467_v41 = vmul.f32 %v792_v29, %v466_v45 }
 0x2b1   :  { %v468_v30 = vmul.f32 %v467_v41, %v461_v50 }
 0x2b3   :  { %v470_v40 = vsel %vm469_vm11, %v461_v50, %v468_v30 }
 0x2b4   :  { %v473_v27 = vsel %vm471_vm12, %v472_v33, %v470_v40 }
 0x2b5   :  { %770 = vpush %v473_v27 }
 0x2b6   :  { %772 = vpush %v487_v59 }
 0x2e6   :  { %s1407_s3 = spop %770 }
 0x2e7   :  { %s773_s4 = spop %772 }
 0x2e8   :  { %v489_v8 = vstv %s773_s4 }
 0x2e9   :  { %793 = vrsqrt.f32 %v489_v8  ;;  %vm497_vm13 = vcmp.eq.f32.partialorder %v489_v8, inf  ;;  %v500_v62 = vand.u32 2147483648, %v489_v8  ;;  %vm499_vm14 = vcmp.eq.f32.partialorder %v489_v8, 0.0 }
 0x2ef   :  { %v794_v23 = vpop.eup %793 }
 0x2f0   :  { %v491_v1 = vmul.f32 %v794_v23, %v489_v8 }
 0x2f2   :  { %v492_v53 = vmul.f32 %v794_v23, %v491_v1 }
 0x2f4   :  { %v493_v31 = vmul.f32 0.5, %v492_v53 }
 0x2f6   :  { %v494_v48 = vsub.f32 1.5, %v493_v31 }
 0x2f8   :  { %v495_v17 = vmul.f32 %v794_v23, %v494_v48 }
 0x2fa   :  { %v496_v26 = vmul.f32 %v495_v17, %v489_v8 }
 0x2fc   :  { %v498_v15 = vsel %vm497_vm13, %v489_v8, %v496_v26 }
 0x2fd   :  { %v501_v9 = vsel %vm499_vm14, %v500_v62, %v498_v15 }
 0x2fe   :  { %774 = vpush %v501_v9 }
 0x2ff   :  { %776 = vpush %v678_v55 }
 0x32f   :  { %s1409_s5 = spop %774 }
 0x330   :  { %s777_s6 = spop %776  ;;  %s503_s9 = smax.f32 %s1409_s5, %s1407_s3 }
 0x331   :  { %v680_v4 = vstv %s777_s6  ;;  %v504_v50 = vstv %s503_s9 }
 0x332   :  { %795 = vrsqrt.f32 %v680_v4  ;;  %vm688_vm8 = vcmp.eq.f32.partialorder %v680_v4, inf  ;;  %v691_v24 = vand.u32 2147483648, %v680_v4  ;;  %vm690_vm0 = vcmp.eq.f32.partialorder %v680_v4, 0.0 }
 0x333   :  { %v505_v10 = vsel %vm49_vm7, %v504_v50, 0.0 }
 0x338   :  { %v796_v19 = vpop.eup %795 }
 0x339   :  { %v682_v47 = vmul.f32 %v796_v19, %v680_v4 }
 0x33b   :  { %v683_v39 = vmul.f32 %v796_v19, %v682_v47 }
 0x33d   :  { %v684_v61 = vmul.f32 0.5, %v683_v39 }
 0x33f   :  { %v685_v6 = vsub.f32 1.5, %v684_v61 }
 0x341   :  { %v686_v54 = vmul.f32 %v796_v19, %v685_v6 }
 0x343   :  { %v687_v34 = vmul.f32 %v686_v54, %v680_v4 }
 0x345   :  { %v689_v22 = vsel %vm688_vm8, %v680_v4, %v687_v34 }
 0x346   :  { %v692_v32 = vsel %vm690_vm0, %v691_v24, %v689_v22 }
 0x347   :  { %778 = vpush %v692_v32 }
 0x348   :  { %780 = vpush %v706_v18 }
 0x378   :  { %s779_s7 = spop %778 }
 0x379   :  { %s781_s8 = spop %780 }
 0x37a   :  { %v708_v38 = vstv %s781_s8 }
 0x37b   :  { %797 = vrsqrt.f32 %v708_v38  ;;  %vm716_vm15 = vcmp.eq.f32.partialorder %v708_v38, inf  ;;  %v719_v49 = vand.u32 2147483648, %v708_v38  ;;  %vm718_vm1 = vcmp.eq.f32.partialorder %v708_v38, 0.0 }
 0x381   :  { %v798_v36 = vpop.eup %797 }
 0x382   :  { %v710_v44 = vmul.f32 %v798_v36, %v708_v38 }
 0x384   :  { %v711_v25 = vmul.f32 %v798_v36, %v710_v44 }
 0x386   :  { %v712_v57 = vmul.f32 0.5, %v711_v25 }
 0x388   :  { %v713_v46 = vsub.f32 1.5, %v712_v57 }
 0x38a   :  { %v714_v43 = vmul.f32 %v798_v36, %v713_v46 }
 0x38c   :  { %v715_v51 = vmul.f32 %v714_v43, %v708_v38 }
 0x38e   :  { %v717_v28 = vsel %vm716_vm15, %v708_v38, %v715_v51 }
 0x38f   :  { %v720_v58 = vsel %vm718_vm1, %v719_v49, %v717_v28 }
 0x390   :  { %782 = vpush %v720_v58 }
 0x3c1   :  { %s783_s10 = spop %782 }
 0x3c2   :  { %s722_s11 = smax.f32 %s783_s10, %s779_s7 }
 0x3c3   :  { %v724_v29 = vstv %s722_s11 }
 0x3c4   :  { %v725_v11 = vsel %vm723_vm2, %v724_v29, %v505_v10 }
 0x3c5   :  { %727 = vst.msk [vmem:[%s1421_s2] sm:$0x1] %vm726_vm4, %v725_v11 }

</bundles_post_ra>
